<compile_context>
chip_gen: v7x
topology: tpu7x:2x2x1
jax: 0.10.0
libtpu: 0.0.40
codegen_flags: <defaults>
</compile_context>

<pallas_src>
import functools

import jax
import jax.numpy as jnp
import numpy as np
from jax import lax
from jax.experimental import pallas as pl
from jax.experimental.pallas import tpu as pltpu

EPS = 1e-5
ROW_TILE = 1024   # preferred row block; v5e/v6e can go 2048, keep <= 1024 on v7x (64 MiB VMEM)


def _rup(x, m):
    return ((x + m - 1) // m) * m


def _pad_to(a, shape):
    return jnp.pad(a, [(0, s - d) for d, s in zip(a.shape, shape)])


def _cparams(sem):
    return pltpu.CompilerParams(dimension_semantics=sem,
                                vmem_limit_bytes=48 * 1024 * 1024)


def _row_blocks(m, pref=ROW_TILE):
    """Row-block size (multiple of 8 sublanes), padded row count, number of blocks."""
    r = min(pref, _rup(m, 8))
    mp = _rup(m, r)
    return r, mp, mp // r


def _bn_scale_shift(stats, gamma, beta, count):
    """Per-channel BN (scale, shift) from accumulated (sum, sum_of_squares). Tiny; runs in XLA."""
    mean = stats[0] / count
    var = jnp.maximum(stats[1] / count - mean * mean, 0.0)   # clamp >= 0
    inv_std = lax.rsqrt(var + EPS)
    scale = gamma * inv_std
    shift = beta - mean * scale
    return scale, shift


# ---------------------------------------------------------------------------
# Kernels
# ---------------------------------------------------------------------------
def _mm_stats_kernel(x_ref, w_ref, y_ref, st_ref):
    """y = x @ w (bf16 out) + per-block partial BN stats (sum, sumsq). Used for conv1 and conv2."""
    y = jnp.dot(x_ref[...], w_ref[...], preferred_element_type=jnp.float32)
    y_ref[...] = y.astype(y_ref.dtype)
    st_ref[0] = jnp.concatenate(
        [jnp.sum(y, axis=0, keepdims=True),
         jnp.sum(y * y, axis=0, keepdims=True)], axis=0)


def _head_kernel(y2_ref, xs_ref, w3_ref, wd_ref, aff2_ref, y3_ref, yd_ref, st_ref,
                 *, rows_valid, block_rows, mask_rows):
    """bn2(precomputed)+relu -> conv3, and downsample conv; emits y3, yd (bf16) + partial stats."""
    a2 = jnp.maximum(y2_ref[...].astype(jnp.float32) * aff2_ref[0:1, :] + aff2_ref[1:2, :], 0.0)
    if mask_rows:   # zero padded rows so they don't pollute bn3/bnd statistics (static branch)
        row = (pl.program_id(0) * block_rows
               + lax.broadcasted_iota(jnp.int32, (block_rows, 1), 0))
        a2 = jnp.where(row < rows_valid, a2, 0.0)
    y3 = jnp.dot(a2.astype(jnp.bfloat16), w3_ref[...], preferred_element_type=jnp.float32)
    yd = jnp.dot(xs_ref[...], wd_ref[...], preferred_element_type=jnp.float32)
    y3_ref[...] = y3.astype(y3_ref.dtype)
    yd_ref[...] = yd.astype(yd_ref.dtype)
    st_ref[0] = jnp.concatenate(
        [jnp.sum(y3, axis=0, keepdims=True), jnp.sum(y3 * y3, axis=0, keepdims=True),
         jnp.sum(yd, axis=0, keepdims=True), jnp.sum(yd * yd, axis=0, keepdims=True)], axis=0)


def _residual_kernel(y3_ref, yd_ref, aff_ref, o_ref):
    """Pure-VPU: bn3 affine + bnd affine + add + relu (stats already reduced)."""
    a = aff_ref[...]
    out = (y3_ref[...].astype(jnp.float32) * a[0:1, :] + a[1:2, :]
           + yd_ref[...].astype(jnp.float32) * a[2:3, :] + a[3:4, :])
    o_ref[...] = jnp.maximum(out, 0.0).astype(o_ref.dtype)


# ---------------------------------------------------------------------------
# Forward pass of ExtraResModule
# ---------------------------------------------------------------------------
def extra_res_module_forward(params, x_nchw):
    N, Cin, H, W = x_nchw.shape
    assert H % 2 == 0 and W % 2 == 0, "stride-2 module expects even spatial dims"
    Ho, Wo = H // 2, W // 2
    Cmid = params["conv1_w"].shape[0]
    Cout = params["conv3_w"].shape[0]
    Cin_p, Cmid_p, Cout_p = _rup(Cin, 128), _rup(Cmid, 128), _rup(Cout, 128)
    M1, Mo = N * H * W, N * Ho * Wo

    x = jnp.transpose(x_nchw, (0, 2, 3, 1)).astype(jnp.float32)          # NCHW -> NHWC

    # ---- weights / BN params: channels-last, lane-padded to 128, bf16 for the MXU ---------
    w1 = _pad_to(params["conv1_w"].reshape(Cmid, Cin).T, (Cin_p, Cmid_p)).astype(jnp.bfloat16)
    w2 = _pad_to(jnp.transpose(params["conv2_w"], (2, 3, 1, 0)).reshape(9, Cmid, Cmid),
                 (9, Cmid_p, Cmid_p)).astype(jnp.bfloat16).reshape(9 * Cmid_p, Cmid_p)
    w3 = _pad_to(params["conv3_w"].reshape(Cout, Cmid).T, (Cmid_p, Cout_p)).astype(jnp.bfloat16)
    wd = _pad_to(params["convd_w"].reshape(Cout, Cin).T, (Cin_p, Cout_p)).astype(jnp.bfloat16)

    def bn_vec(name, cp):
        g, b = params[name]
        return (_pad_to(g, (cp,)).astype(jnp.float32), _pad_to(b, (cp,)).astype(jnp.float32))

    g1, b1 = bn_vec("bn1", Cmid_p)
    g2, b2 = bn_vec("bn2", Cmid_p)
    g3, b3 = bn_vec("bn3", Cout_p)
    gd, bd = bn_vec("bnd", Cout_p)

    # ---- conv1 (1x1 s1): single kernel -> raw y1 (bf16) + per-block BN partial stats -------
    R1, M1p, nb1 = _row_blocks(M1)
    x2d = _pad_to(x.reshape(M1, Cin), (M1p, Cin_p)).astype(jnp.bfloat16)

    y1, st1 = pl.pallas_call(
        _mm_stats_kernel,
        out_shape=(jax.ShapeDtypeStruct((M1p, Cmid_p), jnp.bfloat16),
                   jax.ShapeDtypeStruct((nb1, 2, Cmid_p), jnp.float32)),
        grid=(nb1,),
        in_specs=[pl.BlockSpec((R1, Cin_p), lambda i: (i, 0)),
                  pl.BlockSpec((Cin_p, Cmid_p), lambda i: (0, 0))],
        out_specs=(pl.BlockSpec((R1, Cmid_p), lambda i: (i, 0)),
                   pl.BlockSpec((1, 2, Cmid_p), lambda i: (i, 0, 0))),
        compiler_params=_cparams(("parallel",)),
    )(x2d, w1)
    scale1, shift1 = _bn_scale_shift(jnp.sum(st1, axis=0), g1, b1, float(M1))

    # ---- conv2 (3x3 s2 p1): bn1+relu fused into the host-side 9-tap (im2col) gather --------
    a1 = jnp.maximum(y1[:M1].astype(jnp.float32) * scale1 + shift1, 0.0).astype(jnp.bfloat16)
    a1p = jnp.pad(a1.reshape(N, H, W, Cmid_p), ((0, 0), (1, 1), (1, 1), (0, 0)))
    taps = [a1p[:, ky:ky + 2 * Ho:2, kx:kx + 2 * Wo:2, :]
            for ky in range(3) for kx in range(3)]                        # 9 x (N,Ho,Wo,Cmid_p)
    K2 = 9 * Cmid_p
    R2, Mo_p, nb2 = _row_blocks(Mo)
    cols = _pad_to(jnp.stack(taps, axis=3).reshape(Mo, K2), (Mo_p, K2))   # bf16, K = 9*Cmid_p

    y2, st2 = pl.pallas_call(
        _mm_stats_kernel,
        out_shape=(jax.ShapeDtypeStruct((Mo_p, Cmid_p), jnp.bfloat16),
                   jax.ShapeDtypeStruct((nb2, 2, Cmid_p), jnp.float32)),
        grid=(nb2,),
        in_specs=[pl.BlockSpec((R2, K2), lambda i: (i, 0)),
                  pl.BlockSpec((K2, Cmid_p), lambda i: (0, 0))],
        out_specs=(pl.BlockSpec((R2, Cmid_p), lambda i: (i, 0)),
                   pl.BlockSpec((1, 2, Cmid_p), lambda i: (i, 0, 0))),
        compiler_params=_cparams(("parallel",)),
    )(cols, w2)
    scale2, shift2 = _bn_scale_shift(jnp.sum(st2, axis=0), g2, b2, float(Mo))
    aff2 = jnp.stack([scale2, shift2], axis=0)                            # (2, Cmid_p)

    # ---- downsample input: stride-2 spatial subsample of x ---------------------------------
    # TODO(synk): fold this strided subsample into the head kernel's input DMA (strided copy
    # from an ANY-space ref) to avoid the extra HBM pass.
    xs = _pad_to(x[:, ::2, ::2, :].reshape(Mo, Cin), (Mo_p, Cin_p)).astype(jnp.bfloat16)

    # ---- head: bn2+relu -> conv3 and downsample conv, computed ONCE, y3/yd spilled bf16 ----
    y3, yd, st34 = pl.pallas_call(
        functools.partial(_head_kernel, rows_valid=Mo, block_rows=R2, mask_rows=(Mo_p != Mo)),
        out_shape=(jax.ShapeDtypeStruct((Mo_p, Cout_p), jnp.bfloat16),
                   jax.ShapeDtypeStruct((Mo_p, Cout_p), jnp.bfloat16),
                   jax.ShapeDtypeStruct((nb2, 4, Cout_p), jnp.float32)),
        grid=(nb2,),
        in_specs=[pl.BlockSpec((R2, Cmid_p), lambda i: (i, 0)),
                  pl.BlockSpec((R2, Cin_p), lambda i: (i, 0)),
                  pl.BlockSpec((Cmid_p, Cout_p), lambda i: (0, 0)),
                  pl.BlockSpec((Cin_p, Cout_p), lambda i: (0, 0)),
                  pl.BlockSpec((2, Cmid_p), lambda i: (0, 0))],
        out_specs=(pl.BlockSpec((R2, Cout_p), lambda i: (i, 0)),
                   pl.BlockSpec((R2, Cout_p), lambda i: (i, 0)),
                   pl.BlockSpec((1, 4, Cout_p), lambda i: (i, 0, 0))),
        compiler_params=_cparams(("parallel",)),
    )(y2, xs, w3, wd, aff2)

    stats34 = jnp.sum(st34, axis=0)
    scale3, shift3 = _bn_scale_shift(stats34[0:2], g3, b3, float(Mo))
    scaled, shiftd = _bn_scale_shift(stats34[2:4], gd, bd, float(Mo))
    aff34 = jnp.stack([scale3, shift3, scaled, shiftd], axis=0)           # (4, Cout_p)

    # ---- residual: pure-VPU bn3/bnd affine + add + relu ------------------------------------
    out2d = pl.pallas_call(
        _residual_kernel,
        out_shape=jax.ShapeDtypeStruct((Mo_p, Cout_p), jnp.float32),
        grid=(nb2,),
        in_specs=[pl.BlockSpec((R2, Cout_p), lambda i: (i, 0)),
                  pl.BlockSpec((R2, Cout_p), lambda i: (i, 0)),
                  pl.BlockSpec((4, Cout_p), lambda i: (0, 0))],
        out_specs=pl.BlockSpec((R2, Cout_p), lambda i: (i, 0)),
        compiler_params=_cparams(("parallel",)),
    )(y3, yd, aff34)

    # In real ResNet configs Cout % 128 == 0, so this channel slice is a no-op.
    out = out2d[:Mo, :Cout].reshape(N, Ho, Wo, Cout)
    return jnp.transpose(out, (0, 3, 1, 2))                              # NHWC -> NCHW


# ---------------------------------------------------------------------------
# Parameters (deterministic synthetic init; PyTorch conv weight layout [Cout,Cin,kh,kw])
# ---------------------------------------------------------------------------
def init_params(key, in_channels, internal_channels):
    expansion = 4
    out_channels = expansion * internal_channels
    ks = jax.random.split(key, 8)

    def conv_w(k, cout, cin, kh, kw):
        fan_in = cin * kh * kw
        return jax.random.normal(k, (cout, cin, kh, kw), jnp.float32) * (2.0 / fan_in) ** 0.5

    def bn_p(k, c):
        kg, kb = jax.random.split(k)
        gamma = jax.random.uniform(kg, (c,), jnp.float32, 0.5, 1.5)
        beta = jax.random.normal(kb, (c,), jnp.float32) * 0.1
        return gamma, beta

    return {
        "conv1_w": conv_w(ks[0], internal_channels, in_channels, 1, 1),
        "bn1": bn_p(ks[1], internal_channels),
        "conv2_w": conv_w(ks[2], internal_channels, internal_channels, 3, 3),
        "bn2": bn_p(ks[3], internal_channels),
        "conv3_w": conv_w(ks[4], out_channels, internal_channels, 1, 1),
        "bn3": bn_p(ks[5], out_channels),
        "convd_w": conv_w(ks[6], out_channels, in_channels, 1, 1),
        "bnd": bn_p(ks[7], out_channels),
    }


# ---------------------------------------------------------------------------
# Pure-JAX f32 reference (lax.conv) for correctness verification
# ---------------------------------------------------------------------------
def _bn_train_ref(y, gamma, beta):
    mean = jnp.mean(y, axis=(0, 1, 2), keepdims=True)
    var = jnp.mean((y - mean) ** 2, axis=(0, 1, 2), keepdims=True)
    return (y - mean) * lax.rsqrt(var + EPS) * gamma + beta


def reference_forward(params, x_nchw):
    x = jnp.transpose(x_nchw, (0, 2, 3, 1)).astype(jnp.float32)

    def conv(inp, w, stride, pad):
        w_hwio = jnp.transpose(w, (2, 3, 1, 0))
        return lax.conv_general_dilated(
            inp, w_hwio, (stride, stride), [(pad, pad), (pad, pad)],
            dimension_numbers=("NHWC", "HWIO", "NHWC"))

    g1, b1 = params["bn1"]
    g2, b2 = params["bn2"]
    g3, b3 = params["bn3"]
    gd, bd = params["bnd"]
    y = jax.nn.relu(_bn_train_ref(conv(x, params["conv1_w"], 1, 0), g1, b1))
    y = jax.nn.relu(_bn_train_ref(conv(y, params["conv2_w"], 2, 1), g2, b2))
    y = _bn_train_ref(conv(y, params["conv3_w"], 1, 0), g3, b3)
    res = _bn_train_ref(conv(x, params["convd_w"], 2, 0), gd, bd)
    out = jax.nn.relu(y + res)
    return jnp.transpose(out, (0, 3, 1, 2))


if __name__ == "__main__":
    key = jax.random.PRNGKey(0)
    kx, kp = jax.random.split(key)

    in_channels, internal_channels = 8, 4          # out_channels = 4 * 4 = 16
    N, H, W = 2, 16, 16
    x = jax.random.normal(kx, (N, in_channels, H, W), jnp.float32)   # NCHW like PyTorch
    params = init_params(kp, in_channels, internal_channels)

    fwd = jax.jit(extra_res_module_forward)
    out = jax.block_until_ready(fwd(params, x))
    ref = jax.block_until_ready(reference_forward(params, x))

    assert out.shape == (N, 4 * internal_channels, H // 2, W // 2), out.shape
    # Kernel keeps bf16 activations between MXU stages (f32 accumulation / BN math); reference
    # is pure f32, so the tolerance accounts for bf16 rounding through three conv+BN layers.
    np.testing.assert_allclose(np.asarray(out), np.asarray(ref), rtol=5e-2, atol=5e-2)
    print("KERNEL_OK")
</pallas_src>

<mosaic_0001>
module attributes {stable_mosaic.version = 11 : i64} {
  func.func @_mm_stats_kernel(%arg0: i32, %arg1: memref<512x128xbf16, #tpu.memory_space<vmem>>, %arg2: memref<128x128xbf16, #tpu.memory_space<vmem>>, %arg3: memref<512x128xbf16, #tpu.memory_space<vmem>>, %arg4: memref<1x2x128xf32, #tpu.memory_space<vmem>>) attributes {dimension_semantics = [#tpu.dimension_semantics<parallel>], iteration_bounds = array<i64: 1>, scalar_prefetch = 0 : i64, scratch_operands = 0 : i64, tpu.core_type = #tpu.core_type<tc>, window_params = [{transform_indices = @transform_0, window_bounds = array<i64: 512, 128>}, {pipeline_mode = #tpu.pipeline_mode<synchronous>, transform_indices = @transform_1, window_bounds = array<i64: 128, 128>}, {transform_indices = @transform_2, window_bounds = array<i64: 512, 128>}, {transform_indices = @transform_3, window_bounds = array<i64: 1, 2, 128>}]} {
    %c0 = arith.constant 0 : index
    %c0_0 = arith.constant 0 : index
    %0 = vector.load %arg1[%c0, %c0_0] : memref<512x128xbf16, #tpu.memory_space<vmem>>, vector<512x128xbf16>
    %c0_1 = arith.constant 0 : index
    %c0_2 = arith.constant 0 : index
    %1 = vector.load %arg2[%c0_1, %c0_2] : memref<128x128xbf16, #tpu.memory_space<vmem>>, vector<128x128xbf16>
    %cst = arith.constant dense<0.000000e+00> : vector<512x128xf32>
    %2 = tpu.matmul %0, %1, %cst {dimension_numbers = #tpu.dot_dimension_numbers<[1], [0], [0], [1], [0, 0, 1, 1], [], []>} : vector<512x128xbf16>, vector<128x128xbf16>, vector<512x128xf32> -> vector<512x128xf32>
    %3 = arith.truncf %2 : vector<512x128xf32> to vector<512x128xbf16>
    %c0_3 = arith.constant 0 : index
    %c0_4 = arith.constant 0 : index
    %4 = vector.load %arg3[%c0_3, %c0_4] : memref<512x128xbf16, #tpu.memory_space<vmem>>, vector<512x128xbf16>
    tpu.vector_store %arg3[%c0_3, %c0_4], %3 {strides = array<i32>} : memref<512x128xbf16, #tpu.memory_space<vmem>>, vector<512x128xbf16>,
    %cst_5 = arith.constant dense<0.000000e+00> : vector<128xf32>
    %5 = vector.multi_reduction <add>, %2, %cst_5 [0] : vector<512x128xf32> to vector<128xf32>
    %6 = vector.shape_cast %5 : vector<128xf32> to vector<1x128xf32>
    %7 = arith.mulf %2, %2 : vector<512x128xf32>
    %cst_6 = arith.constant dense<0.000000e+00> : vector<128xf32>
    %8 = vector.multi_reduction <add>, %7, %cst_6 [0] : vector<512x128xf32> to vector<128xf32>
    %9 = vector.shape_cast %8 : vector<128xf32> to vector<1x128xf32>
    %10 = tpu.concatenate %6, %9 in 0 : vector<1x128xf32>, vector<1x128xf32> -> vector<2x128xf32>
    %c0_7 = arith.constant 0 : index
    %c0_8 = arith.constant 0 : index
    %c0_9 = arith.constant 0 : index
    %11 = vector.load %arg4[%c0_7, %c0_8, %c0_9] : memref<1x2x128xf32, #tpu.memory_space<vmem>>, vector<1x2x128xf32>
    %12 = vector.shape_cast %11 : vector<1x2x128xf32> to vector<2x128xf32>
    %13 = vector.shape_cast %10 : vector<2x128xf32> to vector<1x2x128xf32>
    tpu.vector_store %arg4[%c0_7, %c0_8, %c0_9], %13 {strides = array<i32>} : memref<1x2x128xf32, #tpu.memory_space<vmem>>, vector<1x2x128xf32>,
    return
  }
  func.func @transform_0(%arg0: i32) -> (i32, i32) {
    %c0_i32 = arith.constant 0 : i32
    %c0_i32_0 = arith.constant 0 : i32
    return %arg0, %c0_i32 : i32, i32
  }
  func.func @transform_1(%arg0: i32) -> (i32, i32) {
    %c0_i32 = arith.constant 0 : i32
    %c0_i32_0 = arith.constant 0 : i32
    %c0_i32_1 = arith.constant 0 : i32
    return %c0_i32, %c0_i32_0 : i32, i32
  }
  func.func @transform_2(%arg0: i32) -> (i32, i32) {
    %c0_i32 = arith.constant 0 : i32
    %c0_i32_0 = arith.constant 0 : i32
    return %arg0, %c0_i32 : i32, i32
  }
  func.func @transform_3(%arg0: i32) -> (i32, i32, i32) {
    %c0_i32 = arith.constant 0 : i32
    %c0_i32_0 = arith.constant 0 : i32
    %c0_i32_1 = arith.constant 0 : i32
    return %arg0, %c0_i32, %c0_i32_0 : i32, i32, i32
  }
}

module attributes {stable_mosaic.version = 11 : i64} {
  func.func @_mm_stats_kernel(%arg0: i32, %arg1: memref<128x1152xbf16, #tpu.memory_space<vmem>>, %arg2: memref<1152x128xbf16, #tpu.memory_space<vmem>>, %arg3: memref<128x128xbf16, #tpu.memory_space<vmem>>, %arg4: memref<1x2x128xf32, #tpu.memory_space<vmem>>) attributes {dimension_semantics = [#tpu.dimension_semantics<parallel>], iteration_bounds = array<i64: 1>, scalar_prefetch = 0 : i64, scratch_operands = 0 : i64, tpu.core_type = #tpu.core_type<tc>, window_params = [{transform_indices = @transform_0, window_bounds = array<i64: 128, 1152>}, {pipeline_mode = #tpu.pipeline_mode<synchronous>, transform_indices = @transform_1, window_bounds = array<i64: 1152, 128>}, {transform_indices = @transform_2, window_bounds = array<i64: 128, 128>}, {transform_indices = @transform_3, window_bounds = array<i64: 1, 2, 128>}]} {
    %c0 = arith.constant 0 : index
    %c0_0 = arith.constant 0 : index
    %0 = vector.load %arg1[%c0, %c0_0] : memref<128x1152xbf16, #tpu.memory_space<vmem>>, vector<128x1152xbf16>
    %c0_1 = arith.constant 0 : index
    %c0_2 = arith.constant 0 : index
    %1 = vector.load %arg2[%c0_1, %c0_2] : memref<1152x128xbf16, #tpu.memory_space<vmem>>, vector<1152x128xbf16>
    %cst = arith.constant dense<0.000000e+00> : vector<128x128xf32>
    %2 = tpu.matmul %0, %1, %cst {dimension_numbers = #tpu.dot_dimension_numbers<[1], [0], [0], [1], [0, 0, 1, 1], [], []>} : vector<128x1152xbf16>, vector<1152x128xbf16>, vector<128x128xf32> -> vector<128x128xf32>
    %3 = arith.truncf %2 : vector<128x128xf32> to vector<128x128xbf16>
    %c0_3 = arith.constant 0 : index
    %c0_4 = arith.constant 0 : index
    %4 = vector.load %arg3[%c0_3, %c0_4] : memref<128x128xbf16, #tpu.memory_space<vmem>>, vector<128x128xbf16>
    tpu.vector_store %arg3[%c0_3, %c0_4], %3 {strides = array<i32>} : memref<128x128xbf16, #tpu.memory_space<vmem>>, vector<128x128xbf16>,
    %cst_5 = arith.constant dense<0.000000e+00> : vector<128xf32>
    %5 = vector.multi_reduction <add>, %2, %cst_5 [0] : vector<128x128xf32> to vector<128xf32>
    %6 = vector.shape_cast %5 : vector<128xf32> to vector<1x128xf32>
    %7 = arith.mulf %2, %2 : vector<128x128xf32>
    %cst_6 = arith.constant dense<0.000000e+00> : vector<128xf32>
    %8 = vector.multi_reduction <add>, %7, %cst_6 [0] : vector<128x128xf32> to vector<128xf32>
    %9 = vector.shape_cast %8 : vector<128xf32> to vector<1x128xf32>
    %10 = tpu.concatenate %6, %9 in 0 : vector<1x128xf32>, vector<1x128xf32> -> vector<2x128xf32>
    %c0_7 = arith.constant 0 : index
    %c0_8 = arith.constant 0 : index
    %c0_9 = arith.constant 0 : index
    %11 = vector.load %arg4[%c0_7, %c0_8, %c0_9] : memref<1x2x128xf32, #tpu.memory_space<vmem>>, vector<1x2x128xf32>
    %12 = vector.shape_cast %11 : vector<1x2x128xf32> to vector<2x128xf32>
    %13 = vector.shape_cast %10 : vector<2x128xf32> to vector<1x2x128xf32>
    tpu.vector_store %arg4[%c0_7, %c0_8, %c0_9], %13 {strides = array<i32>} : memref<1x2x128xf32, #tpu.memory_space<vmem>>, vector<1x2x128xf32>,
    return
  }
  func.func @transform_0(%arg0: i32) -> (i32, i32) {
    %c0_i32 = arith.constant 0 : i32
    %c0_i32_0 = arith.constant 0 : i32
    return %arg0, %c0_i32 : i32, i32
  }
  func.func @transform_1(%arg0: i32) -> (i32, i32) {
    %c0_i32 = arith.constant 0 : i32
    %c0_i32_0 = arith.constant 0 : i32
    %c0_i32_1 = arith.constant 0 : i32
    return %c0_i32, %c0_i32_0 : i32, i32
  }
  func.func @transform_2(%arg0: i32) -> (i32, i32) {
    %c0_i32 = arith.constant 0 : i32
    %c0_i32_0 = arith.constant 0 : i32
    return %arg0, %c0_i32 : i32, i32
  }
  func.func @transform_3(%arg0: i32) -> (i32, i32, i32) {
    %c0_i32 = arith.constant 0 : i32
    %c0_i32_0 = arith.constant 0 : i32
    %c0_i32_1 = arith.constant 0 : i32
    return %arg0, %c0_i32, %c0_i32_0 : i32, i32, i32
  }
}

module attributes {stable_mosaic.version = 11 : i64} {
  func.func @_residual_kernel(%arg0: i32, %arg1: memref<128x128xbf16, #tpu.memory_space<vmem>>, %arg2: memref<128x128xbf16, #tpu.memory_space<vmem>>, %arg3: memref<4x128xf32, #tpu.memory_space<vmem>>, %arg4: memref<128x128xf32, #tpu.memory_space<vmem>>) attributes {dimension_semantics = [#tpu.dimension_semantics<parallel>], iteration_bounds = array<i64: 1>, scalar_prefetch = 0 : i64, scratch_operands = 0 : i64, tpu.core_type = #tpu.core_type<tc>, window_params = [{transform_indices = @transform_0, window_bounds = array<i64: 128, 128>}, {transform_indices = @transform_1, window_bounds = array<i64: 128, 128>}, {pipeline_mode = #tpu.pipeline_mode<synchronous>, transform_indices = @transform_2, window_bounds = array<i64: 4, 128>}, {transform_indices = @transform_3, window_bounds = array<i64: 128, 128>}]} {
    %c0 = arith.constant 0 : index
    %c0_0 = arith.constant 0 : index
    %0 = vector.load %arg3[%c0, %c0_0] : memref<4x128xf32, #tpu.memory_space<vmem>>, vector<4x128xf32>
    %c0_1 = arith.constant 0 : index
    %c0_2 = arith.constant 0 : index
    %1 = vector.load %arg1[%c0_1, %c0_2] : memref<128x128xbf16, #tpu.memory_space<vmem>>, vector<128x128xbf16>
    %2 = arith.extf %1 : vector<128x128xbf16> to vector<128x128xf32>
    %3 = vector.extract_strided_slice %0 {offsets = [0, 0], sizes = [1, 128], strides = [1, 1]} : vector<4x128xf32> to vector<1x128xf32>
    %4 = vector.broadcast %3 : vector<1x128xf32> to vector<128x128xf32>
    %5 = arith.mulf %2, %4 : vector<128x128xf32>
    %6 = vector.extract_strided_slice %0 {offsets = [1, 0], sizes = [1, 128], strides = [1, 1]} : vector<4x128xf32> to vector<1x128xf32>
    %7 = vector.broadcast %6 : vector<1x128xf32> to vector<128x128xf32>
    %8 = arith.addf %5, %7 : vector<128x128xf32>
    %c0_3 = arith.constant 0 : index
    %c0_4 = arith.constant 0 : index
    %9 = vector.load %arg2[%c0_3, %c0_4] : memref<128x128xbf16, #tpu.memory_space<vmem>>, vector<128x128xbf16>
    %10 = arith.extf %9 : vector<128x128xbf16> to vector<128x128xf32>
    %11 = vector.extract_strided_slice %0 {offsets = [2, 0], sizes = [1, 128], strides = [1, 1]} : vector<4x128xf32> to vector<1x128xf32>
    %12 = vector.broadcast %11 : vector<1x128xf32> to vector<128x128xf32>
    %13 = arith.mulf %10, %12 : vector<128x128xf32>
    %14 = arith.addf %8, %13 : vector<128x128xf32>
    %15 = vector.extract_strided_slice %0 {offsets = [3, 0], sizes = [1, 128], strides = [1, 1]} : vector<4x128xf32> to vector<1x128xf32>
    %16 = vector.broadcast %15 : vector<1x128xf32> to vector<128x128xf32>
    %17 = arith.addf %14, %16 : vector<128x128xf32>
    %cst = arith.constant 0.000000e+00 : f32
    %18 = vector.broadcast %cst : f32 to vector<128x128xf32>
    %19 = arith.maximumf %17, %18 : vector<128x128xf32>
    %c0_5 = arith.constant 0 : index
    %c0_6 = arith.constant 0 : index
    %20 = vector.load %arg4[%c0_5, %c0_6] : memref<128x128xf32, #tpu.memory_space<vmem>>, vector<128x128xf32>
    tpu.vector_store %arg4[%c0_5, %c0_6], %19 {strides = array<i32>} : memref<128x128xf32, #tpu.memory_space<vmem>>, vector<128x128xf32>,
    return
  }
  func.func @transform_0(%arg0: i32) -> (i32, i32) {
    %c0_i32 = arith.constant 0 : i32
    %c0_i32_0 = arith.constant 0 : i32
    return %arg0, %c0_i32 : i32, i32
  }
  func.func @transform_1(%arg0: i32) -> (i32, i32) {
    %c0_i32 = arith.constant 0 : i32
    %c0_i32_0 = arith.constant 0 : i32
    return %arg0, %c0_i32 : i32, i32
  }
  func.func @transform_2(%arg0: i32) -> (i32, i32) {
    %c0_i32 = arith.constant 0 : i32
    %c0_i32_0 = arith.constant 0 : i32
    %c0_i32_1 = arith.constant 0 : i32
    return %c0_i32, %c0_i32_0 : i32, i32
  }
  func.func @transform_3(%arg0: i32) -> (i32, i32) {
    %c0_i32 = arith.constant 0 : i32
    %c0_i32_0 = arith.constant 0 : i32
    return %arg0, %c0_i32 : i32, i32
  }
}

module attributes {stable_mosaic.version = 11 : i64} {
  func.func @_head_kernel(%arg0: i32, %arg1: memref<128x128xbf16, #tpu.memory_space<vmem>>, %arg2: memref<128x128xbf16, #tpu.memory_space<vmem>>, %arg3: memref<128x128xbf16, #tpu.memory_space<vmem>>, %arg4: memref<128x128xbf16, #tpu.memory_space<vmem>>, %arg5: memref<2x128xf32, #tpu.memory_space<vmem>>, %arg6: memref<128x128xbf16, #tpu.memory_space<vmem>>, %arg7: memref<128x128xbf16, #tpu.memory_space<vmem>>, %arg8: memref<1x4x128xf32, #tpu.memory_space<vmem>>) attributes {dimension_semantics = [#tpu.dimension_semantics<parallel>], iteration_bounds = array<i64: 1>, scalar_prefetch = 0 : i64, scratch_operands = 0 : i64, tpu.core_type = #tpu.core_type<tc>, window_params = [{transform_indices = @transform_0, window_bounds = array<i64: 128, 128>}, {transform_indices = @transform_1, window_bounds = array<i64: 128, 128>}, {pipeline_mode = #tpu.pipeline_mode<synchronous>, transform_indices = @transform_2, window_bounds = array<i64: 128, 128>}, {pipeline_mode = #tpu.pipeline_mode<synchronous>, transform_indices = @transform_3, window_bounds = array<i64: 128, 128>}, {pipeline_mode = #tpu.pipeline_mode<synchronous>, transform_indices = @transform_4, window_bounds = array<i64: 2, 128>}, {transform_indices = @transform_5, window_bounds = array<i64: 128, 128>}, {transform_indices = @transform_6, window_bounds = array<i64: 128, 128>}, {transform_indices = @transform_7, window_bounds = array<i64: 1, 4, 128>}]} {
    %c0 = arith.constant 0 : index
    %c0_0 = arith.constant 0 : index
    %0 = vector.load %arg1[%c0, %c0_0] : memref<128x128xbf16, #tpu.memory_space<vmem>>, vector<128x128xbf16>
    %1 = arith.extf %0 : vector<128x128xbf16> to vector<128x128xf32>
    %c0_1 = arith.constant 0 : index
    %c0_2 = arith.constant 0 : index
    %2 = vector.load %arg5[%c0_1, %c0_2] : memref<2x128xf32, #tpu.memory_space<vmem>>, vector<1x128xf32>
    %3 = vector.broadcast %2 : vector<1x128xf32> to vector<128x128xf32>
    %4 = arith.mulf %1, %3 : vector<128x128xf32>
    %c1 = arith.constant 1 : index
    %c0_3 = arith.constant 0 : index
    %5 = vector.load %arg5[%c1, %c0_3] : memref<2x128xf32, #tpu.memory_space<vmem>>, vector<1x128xf32>
    %6 = vector.broadcast %5 : vector<1x128xf32> to vector<128x128xf32>
    %7 = arith.addf %4, %6 : vector<128x128xf32>
    %cst = arith.constant 0.000000e+00 : f32
    %8 = vector.broadcast %cst : f32 to vector<128x128xf32>
    %9 = arith.maximumf %7, %8 : vector<128x128xf32>
    %10 = arith.truncf %9 : vector<128x128xf32> to vector<128x128xbf16>
    %c0_4 = arith.constant 0 : index
    %c0_5 = arith.constant 0 : index
    %11 = vector.load %arg3[%c0_4, %c0_5] : memref<128x128xbf16, #tpu.memory_space<vmem>>, vector<128x128xbf16>
    %cst_6 = arith.constant dense<0.000000e+00> : vector<128x128xf32>
    %12 = tpu.matmul %10, %11, %cst_6 {dimension_numbers = #tpu.dot_dimension_numbers<[1], [0], [0], [1], [0, 0, 1, 1], [], []>} : vector<128x128xbf16>, vector<128x128xbf16>, vector<128x128xf32> -> vector<128x128xf32>
    %c0_7 = arith.constant 0 : index
    %c0_8 = arith.constant 0 : index
    %13 = vector.load %arg2[%c0_7, %c0_8] : memref<128x128xbf16, #tpu.memory_space<vmem>>, vector<128x128xbf16>
    %c0_9 = arith.constant 0 : index
    %c0_10 = arith.constant 0 : index
    %14 = vector.load %arg4[%c0_9, %c0_10] : memref<128x128xbf16, #tpu.memory_space<vmem>>, vector<128x128xbf16>
    %cst_11 = arith.constant dense<0.000000e+00> : vector<128x128xf32>
    %15 = tpu.matmul %13, %14, %cst_11 {dimension_numbers = #tpu.dot_dimension_numbers<[1], [0], [0], [1], [0, 0, 1, 1], [], []>} : vector<128x128xbf16>, vector<128x128xbf16>, vector<128x128xf32> -> vector<128x128xf32>
    %16 = arith.truncf %12 : vector<128x128xf32> to vector<128x128xbf16>
    %c0_12 = arith.constant 0 : index
    %c0_13 = arith.constant 0 : index
    %17 = vector.load %arg6[%c0_12, %c0_13] : memref<128x128xbf16, #tpu.memory_space<vmem>>, vector<128x128xbf16>
    tpu.vector_store %arg6[%c0_12, %c0_13], %16 {strides = array<i32>} : memref<128x128xbf16, #tpu.memory_space<vmem>>, vector<128x128xbf16>,
    %18 = arith.truncf %15 : vector<128x128xf32> to vector<128x128xbf16>
    %c0_14 = arith.constant 0 : index
    %c0_15 = arith.constant 0 : index
    %19 = vector.load %arg7[%c0_14, %c0_15] : memref<128x128xbf16, #tpu.memory_space<vmem>>, vector<128x128xbf16>
    tpu.vector_store %arg7[%c0_14, %c0_15], %18 {strides = array<i32>} : memref<128x128xbf16, #tpu.memory_space<vmem>>, vector<128x128xbf16>,
    %cst_16 = arith.constant dense<0.000000e+00> : vector<128xf32>
    %20 = vector.multi_reduction <add>, %12, %cst_16 [0] : vector<128x128xf32> to vector<128xf32>
    %21 = vector.shape_cast %20 : vector<128xf32> to vector<1x128xf32>
    %22 = arith.mulf %12, %12 : vector<128x128xf32>
    %cst_17 = arith.constant dense<0.000000e+00> : vector<128xf32>
    %23 = vector.multi_reduction <add>, %22, %cst_17 [0] : vector<128x128xf32> to vector<128xf32>
    %24 = vector.shape_cast %23 : vector<128xf32> to vector<1x128xf32>
    %cst_18 = arith.constant dense<0.000000e+00> : vector<128xf32>
    %25 = vector.multi_reduction <add>, %15, %cst_18 [0] : vector<128x128xf32> to vector<128xf32>
    %26 = vector.shape_cast %25 : vector<128xf32> to vector<1x128xf32>
    %27 = arith.mulf %15, %15 : vector<128x128xf32>
    %cst_19 = arith.constant dense<0.000000e+00> : vector<128xf32>
    %28 = vector.multi_reduction <add>, %27, %cst_19 [0] : vector<128x128xf32> to vector<128xf32>
    %29 = vector.shape_cast %28 : vector<128xf32> to vector<1x128xf32>
    %30 = tpu.concatenate %21, %24, %26, %29 in 0 : vector<1x128xf32>, vector<1x128xf32>, vector<1x128xf32>, vector<1x128xf32> -> vector<4x128xf32>
    %c0_20 = arith.constant 0 : index
    %c0_21 = arith.constant 0 : index
    %c0_22 = arith.constant 0 : index
    %31 = vector.load %arg8[%c0_20, %c0_21, %c0_22] : memref<1x4x128xf32, #tpu.memory_space<vmem>>, vector<1x4x128xf32>
    %32 = vector.shape_cast %31 : vector<1x4x128xf32> to vector<4x128xf32>
    %33 = vector.shape_cast %30 : vector<4x128xf32> to vector<1x4x128xf32>
    tpu.vector_store %arg8[%c0_20, %c0_21, %c0_22], %33 {strides = array<i32>} : memref<1x4x128xf32, #tpu.memory_space<vmem>>, vector<1x4x128xf32>,
    return
  }
  func.func @transform_0(%arg0: i32) -> (i32, i32) {
    %c0_i32 = arith.constant 0 : i32
    %c0_i32_0 = arith.constant 0 : i32
    return %arg0, %c0_i32 : i32, i32
  }
  func.func @transform_1(%arg0: i32) -> (i32, i32) {
    %c0_i32 = arith.constant 0 : i32
    %c0_i32_0 = arith.constant 0 : i32
    return %arg0, %c0_i32 : i32, i32
  }
  func.func @transform_2(%arg0: i32) -> (i32, i32) {
    %c0_i32 = arith.constant 0 : i32
    %c0_i32_0 = arith.constant 0 : i32
    %c0_i32_1 = arith.constant 0 : i32
    return %c0_i32, %c0_i32_0 : i32, i32
  }
  func.func @transform_3(%arg0: i32) -> (i32, i32) {
    %c0_i32 = arith.constant 0 : i32
    %c0_i32_0 = arith.constant 0 : i32
    %c0_i32_1 = arith.constant 0 : i32
    return %c0_i32, %c0_i32_0 : i32, i32
  }
  func.func @transform_4(%arg0: i32) -> (i32, i32) {
    %c0_i32 = arith.constant 0 : i32
    %c0_i32_0 = arith.constant 0 : i32
    %c0_i32_1 = arith.constant 0 : i32
    return %c0_i32, %c0_i32_0 : i32, i32
  }
  func.func @transform_5(%arg0: i32) -> (i32, i32) {
    %c0_i32 = arith.constant 0 : i32
    %c0_i32_0 = arith.constant 0 : i32
    return %arg0, %c0_i32 : i32, i32
  }
  func.func @transform_6(%arg0: i32) -> (i32, i32) {
    %c0_i32 = arith.constant 0 : i32
    %c0_i32_0 = arith.constant 0 : i32
    return %arg0, %c0_i32 : i32, i32
  }
  func.func @transform_7(%arg0: i32) -> (i32, i32, i32) {
    %c0_i32 = arith.constant 0 : i32
    %c0_i32_0 = arith.constant 0 : i32
    %c0_i32_1 = arith.constant 0 : i32
    return %arg0, %c0_i32, %c0_i32_0 : i32, i32, i32
  }
}

</mosaic_0001>

<bundles_post_ra>
// kernel: extra_res_module_forward.4
= control target key start
LH: loop header
LB: loop body
LE: loop exit
PB: predicated region body
PF: predicated region fallthrough
CT: control target
= control target key end

     0   :  { %vm1145_vm0 = vcmask 1040384   ;;  %s2122_s1 = inlined_call_operand.vmem [shape: bf16[128,128], index: 1, kind: input, shape index: {}]   ;;  %s2123_s0 = inlined_call_operand.vmem [shape: bf16[512,128], index: 0, kind: input, shape index: {}]   ;;  %s2124_s2 = inlined_call_operand.vmem [shape: bf16[512,128], index: 2, kind: output, shape index: {0}]   ;;  %s2125_s3 = inlined_call_operand.vmem [shape: f32[1,2,128], index: 3, kind: output, shape index: {1}]  }
   0x1   :  { %v1651_v0 = vld [vmem:[%s2122_s1] sm:$0xff]   ;;  %v1652_v1 = vld [vmem:[%s2122_s1 + $0x8] sm:$0xff]   ;;  %v1653_v2 = vld [vmem:[%s2122_s1 + $0x10] sm:$0xff]  }
   0x2   :  { %1555 = vmatprep.subr.bf16.mxu0 %v1651_v0  ;;  %1635 = vmatprep.subr.bf16.mxu1 %v1651_v0  ;;  %v1654_v3 = vld [vmem:[%s2122_s1 + $0x18] sm:$0xff]   ;;  %v1659_v4 = vld [vmem:[%s2123_s0] sm:$0xff]   ;;  %v1656_v6 = vld [vmem:[%s2122_s1 + $0x28] sm:$0xff]  }
   0x3   :  { %1556 = vmatpush3.bf16.msra.mxu0 %v1651_v0  ;;  %1643 = vmatpush3.bf16.msra.mxu1 %v1651_v0  ;;  %v1655_v5 = vld [vmem:[%s2122_s1 + $0x20] sm:$0xff]   ;;  %v1657_v7 = vld [vmem:[%s2122_s1 + $0x30] sm:$0xff]   ;;  %v1658_v8 = vld [vmem:[%s2122_s1 + $0x38] sm:$0xff]  }
   0x4   :  { %1557 = vmatprep.subr.bf16.mxu0 %v1652_v1  ;;  %1636 = vmatprep.subr.bf16.mxu1 %v1652_v1  ;;  %v1675_v9 = vld [vmem:[%s2123_s0 + $0x80] sm:$0xff]   ;;  %v1660_v10 = vld [vmem:[%s2123_s0 + $0x8] sm:$0xff]   ;;  %v1661_v11 = vld [vmem:[%s2123_s0 + $0x10] sm:$0xff]  }
   0x5   :  { %1571 = vmatprep.mubr.bf16.mxu0 %v1659_v4  ;;  %1603 = vmatprep.mubr.bf16.mxu1 %v1675_v9  ;;  %v1676_v12 = vld [vmem:[%s2123_s0 + $0x88] sm:$0xff]   ;;  %v1677_v13 = vld [vmem:[%s2123_s0 + $0x90] sm:$0xff]   ;;  %v1662_v14 = vld [vmem:[%s2123_s0 + $0x18] sm:$0xff]  }
   0x6   :  { %v1663_v15 = vld [vmem:[%s2123_s0 + $0x20] sm:$0xff]   ;;  %v1678_v16 = vld [vmem:[%s2123_s0 + $0x98] sm:$0xff]   ;;  %v1664_v18 = vld [vmem:[%s2123_s0 + $0x28] sm:$0xff]  }
   0x7   :  { %1558 = vmatpush3.bf16.msra.mxu0 %v1652_v1  ;;  %1644 = vmatpush3.bf16.msra.mxu1 %v1652_v1  ;;  %v1679_v17 = vld [vmem:[%s2123_s0 + $0xa0] sm:$0xff]   ;;  %v1680_v19 = vld [vmem:[%s2123_s0 + $0xa8] sm:$0xff]   ;;  %v1665_v20 = vld [vmem:[%s2123_s0 + $0x30] sm:$0xff]  }
   0x8   :  { %1559 = vmatprep.subr.bf16.mxu0 %v1653_v2  ;;  %1637 = vmatprep.subr.bf16.mxu1 %v1653_v2  ;;  %v1681_v21 = vld [vmem:[%s2123_s0 + $0xb0] sm:$0xff]   ;;  %v1666_v22 = vld [vmem:[%s2123_s0 + $0x38] sm:$0xff]   ;;  %v1667_v24 = vld [vmem:[%s2123_s0 + $0x40] sm:$0xff]  }
   0x9   :  { %v1682_v23 = vld [vmem:[%s2123_s0 + $0xb8] sm:$0xff]   ;;  %v1683_v25 = vld [vmem:[%s2123_s0 + $0xc0] sm:$0xff]   ;;  %v1668_v26 = vld [vmem:[%s2123_s0 + $0x48] sm:$0xff]  }
   0xa   :  { %v1684_v27 = vld [vmem:[%s2123_s0 + $0xc8] sm:$0xff]   ;;  %v1669_v28 = vld [vmem:[%s2123_s0 + $0x50] sm:$0xff]   ;;  %v1670_v30 = vld [vmem:[%s2123_s0 + $0x58] sm:$0xff]  }
   0xb   :  { %1560 = vmatpush3.bf16.msra.mxu0 %v1653_v2  ;;  %1645 = vmatpush3.bf16.msra.mxu1 %v1653_v2  ;;  %v1685_v29 = vld [vmem:[%s2123_s0 + $0xd0] sm:$0xff]   ;;  %v1686_v31 = vld [vmem:[%s2123_s0 + $0xd8] sm:$0xff]   ;;  %v1671_v32 = vld [vmem:[%s2123_s0 + $0x60] sm:$0xff]  }
   0xc   :  { %1561 = vmatprep.subr.bf16.mxu0 %v1654_v3  ;;  %1638 = vmatprep.subr.bf16.mxu1 %v1654_v3  ;;  %v1687_v33 = vld [vmem:[%s2123_s0 + $0xe0] sm:$0xff]   ;;  %v1672_v34 = vld [vmem:[%s2123_s0 + $0x68] sm:$0xff]   ;;  %v1673_v36 = vld [vmem:[%s2123_s0 + $0x70] sm:$0xff]  }
   0xd   :  { %v1688_v35 = vld [vmem:[%s2123_s0 + $0xe8] sm:$0xff]   ;;  %v1689_v37 = vld [vmem:[%s2123_s0 + $0xf0] sm:$0xff]   ;;  %v1674_v38 = vld [vmem:[%s2123_s0 + $0x78] sm:$0xff]  }
   0xe   :  { %v1690_v39 = vld [vmem:[%s2123_s0 + $0xf8] sm:$0xff]  }
   0xf   :  { %1562 = vmatpush3.bf16.msra.mxu0 %v1654_v3  ;;  %1646 = vmatpush3.bf16.msra.mxu1 %v1654_v3 }
  0x10   :  { %1563 = vmatprep.subr.bf16.mxu0 %v1655_v5  ;;  %1639 = vmatprep.subr.bf16.mxu1 %v1655_v5 }
  0x13   :  { %1564 = vmatpush3.bf16.msra.mxu0 %v1655_v5  ;;  %1647 = vmatpush3.bf16.msra.mxu1 %v1655_v5 }
  0x14   :  { %1565 = vmatprep.subr.bf16.mxu0 %v1656_v6  ;;  %1640 = vmatprep.subr.bf16.mxu1 %v1656_v6 }
  0x17   :  { %1566 = vmatpush3.bf16.msra.mxu0 %v1656_v6  ;;  %1648 = vmatpush3.bf16.msra.mxu1 %v1656_v6 }
  0x18   :  { %1567 = vmatprep.subr.bf16.mxu0 %v1657_v7  ;;  %1641 = vmatprep.subr.bf16.mxu1 %v1657_v7 }
  0x1b   :  { %1568 = vmatpush3.bf16.msra.mxu0 %v1657_v7  ;;  %1649 = vmatpush3.bf16.msra.mxu1 %v1657_v7 }
  0x1c   :  { %1569 = vmatprep.subr.bf16.mxu0 %v1658_v8  ;;  %1642 = vmatprep.subr.bf16.mxu1 %v1658_v8 }
  0x1f   :  { %1570 = vmatpush3.bf16.msra.mxu0 %v1658_v8  ;;  %1650 = vmatpush3.bf16.msra.mxu1 %v1658_v8 }
  0x22   :  { %1572 = vmatmul.mubr.bf16.vlgmr.msra.gmra.mrb[0].mxu0 %v1660_v10  ;;  %1604 = vmatmul.mubr.bf16.vlgmr.msra.gmra.mrb[0].mxu1 %v1676_v12 }
  0x23   :  { %1575 = vmatprep.mubr.bf16.mxu0 %v1661_v11  ;;  %1607 = vmatprep.mubr.bf16.mxu1 %v1677_v13 }
  0x2a   :  { %1576 = vmatmul.mubr.bf16.gmra.mrb[4].mxu0 %v1662_v14  ;;  %1608 = vmatmul.mubr.bf16.gmra.mrb[4].mxu1 %v1678_v16 }
  0x2b   :  { %1579 = vmatprep.mubr.bf16.mxu0 %v1663_v15  ;;  %1611 = vmatprep.mubr.bf16.mxu1 %v1679_v17 }
  0x32   :  { %1580 = vmatmul.mubr.bf16.gmra.mrb[8].mxu0 %v1664_v18  ;;  %1612 = vmatmul.mubr.bf16.gmra.mrb[8].mxu1 %v1680_v19 }
  0x33   :  { %1583 = vmatprep.mubr.bf16.mxu0 %v1665_v20  ;;  %1615 = vmatprep.mubr.bf16.mxu1 %v1681_v21 }
  0x3a   :  { %1584 = vmatmul.mubr.bf16.gmra.mrb[12].mxu0 %v1666_v22  ;;  %1616 = vmatmul.mubr.bf16.gmra.mrb[12].mxu1 %v1682_v23 }
  0x3b   :  { %1587 = vmatprep.mubr.bf16.mxu0 %v1667_v24  ;;  %1619 = vmatprep.mubr.bf16.mxu1 %v1683_v25 }
  0x42   :  { %1588 = vmatmul.mubr.bf16.gmra.mrb[16].mxu0 %v1668_v26  ;;  %1620 = vmatmul.mubr.bf16.gmra.mrb[16].mxu1 %v1684_v27 }
  0x43   :  { %1591 = vmatprep.mubr.bf16.mxu0 %v1669_v28  ;;  %1623 = vmatprep.mubr.bf16.mxu1 %v1685_v29 }
  0x4a   :  { %1592 = vmatmul.mubr.bf16.gmra.mrb[20].mxu0 %v1670_v30  ;;  %1624 = vmatmul.mubr.bf16.gmra.mrb[20].mxu1 %v1686_v31 }
  0x4b   :  { %1595 = vmatprep.mubr.bf16.mxu0 %v1671_v32  ;;  %1627 = vmatprep.mubr.bf16.mxu1 %v1687_v33 }
  0x52   :  { %1596 = vmatmul.mubr.bf16.gmra.mrb[24].mxu0 %v1672_v34  ;;  %1628 = vmatmul.mubr.bf16.gmra.mrb[24].mxu1 %v1688_v35 }
  0x53   :  { %1599 = vmatprep.mubr.bf16.mxu0 %v1673_v36  ;;  %1631 = vmatprep.mubr.bf16.mxu1 %v1689_v37 }
  0x5a   :  { %1600 = vmatmul.mubr.bf16.gmra.mrb[28].mxu0 %v1674_v38  ;;  %1632 = vmatmul.mubr.bf16.gmra.mrb[28].mxu1 %v1690_v39 }
  0xf5   :  { %v1573_v40 = vpop.f32.mrb[0].mxu0  ;;  %v1831_v41 = vpop.f32.mrb[0].mxu1 }
  0xf6   :  { %v368_v42 = vpop.f32.mrb[1].mxu0  ;;  %v1833_v43 = vpop.f32.mrb[1].mxu1  ;;  %v1014_v55 = vmul.f32 %v1573_v40, %v1573_v40 }
  0xf7   :  { %v1574_v44 = vpop.f32.mrb[2].mxu0  ;;  %v1835_v45 = vpop.f32.mrb[2].mxu1  ;;  %v1012_v46 = vmul.f32 %v368_v42, %v368_v42 }
  0xf8   :  { %v1332_v47 = vpack.c.bf16 %v1574_v44, %v1573_v40  ;;  %v371_v48 = vpop.f32.mrb[3].mxu0  ;;  %v1412_v49 = vpack.c.bf16 %v1835_v45, %v1831_v41  ;;  %v1839_v50 = vpop.f32.mrb[3].mxu1  ;;  %v1015_v58 = vmul.f32 %v1574_v44, %v1574_v44 }
  0xf9   :  { %v1327_v51 = vpack.c.bf16 %v371_v48, %v368_v42  ;;  %v943_v52 = vadd.f32 %v371_v48, %v368_v42  ;;  %v1013_v53 = vmul.f32 %v371_v48, %v371_v48  ;;  %v1407_v54 = vpack.c.bf16 %v1839_v50, %v1833_v43 }
  0xfa   :  { %1484 = vst [vmem:[%s2124_s2 + $0x8] sm:$0xff] %v1332_v47   ;;  %1500 = vst [vmem:[%s2124_s2 + $0x88] sm:$0xff] %v1412_v49  }
  0xfb   :  { %1328 = vst [vmem:[%s2124_s2] sm:$0xff] %v1327_v51   ;;  %v944_v56 = vadd.f32 %v1573_v40, %v943_v52  ;;  %v1076_v57 = vadd.f32 %v1013_v53, %v1012_v46  ;;  %1499 = vst [vmem:[%s2124_s2 + $0x80] sm:$0xff] %v1407_v54  }
  0xfd   :  { %v1077_v59 = vadd.f32 %v1076_v57, %v1014_v55  ;;  %v1577_v60 = vpop.f32.mrb[4].mxu0  ;;  %v945_v61 = vadd.f32 %v1574_v44, %v944_v56  ;;  %v1855_v62 = vpop.f32.mrb[4].mxu1 }
  0xfe   :  { %v384_v63 = vpop.f32.mrb[5].mxu0  ;;  %v1857_v0 = vpop.f32.mrb[5].mxu1  ;;  %v1018_v15 = vmul.f32 %v1577_v60, %v1577_v60 }
  0xff   :  { %v946_v1 = vadd.f32 %v945_v61, %v384_v63  ;;  %v1016_v2 = vmul.f32 %v384_v63, %v384_v63  ;;  %v1078_v3 = vadd.f32 %v1077_v59, %v1015_v58  ;;  %v1578_v4 = vpop.f32.mrb[6].mxu0  ;;  %v1859_v5 = vpop.f32.mrb[6].mxu1 }
 0x100   :  { %v1342_v6 = vpack.c.bf16 %v1578_v4, %v1577_v60  ;;  %v387_v7 = vpop.f32.mrb[7].mxu0  ;;  %v1422_v8 = vpack.c.bf16 %v1859_v5, %v1855_v62  ;;  %v1863_v9 = vpop.f32.mrb[7].mxu1  ;;  %v1019_v18 = vmul.f32 %v1578_v4, %v1578_v4 }
 0x101   :  { %v1079_v10 = vadd.f32 %v1078_v3, %v1016_v2  ;;  %v1337_v11 = vpack.c.bf16 %v387_v7, %v384_v63  ;;  %v947_v12 = vadd.f32 %v946_v1, %v387_v7  ;;  %v1017_v13 = vmul.f32 %v387_v7, %v387_v7 }
 0x102   :  { %1486 = vst [vmem:[%s2124_s2 + $0x18] sm:$0xff] %v1342_v6   ;;  %1502 = vst [vmem:[%s2124_s2 + $0x98] sm:$0xff] %v1422_v8   ;;  %v1417_v14 = vpack.c.bf16 %v1863_v9, %v1857_v0 }
 0x103   :  { %1485 = vst [vmem:[%s2124_s2 + $0x10] sm:$0xff] %v1337_v11   ;;  %v948_v16 = vadd.f32 %v1577_v60, %v947_v12  ;;  %v1080_v17 = vadd.f32 %v1079_v10, %v1017_v13 }
 0x104   :  { %1501 = vst [vmem:[%s2124_s2 + $0x90] sm:$0xff] %v1417_v14  }
 0x105   :  { %v1081_v19 = vadd.f32 %v1080_v17, %v1018_v15  ;;  %v1581_v20 = vpop.f32.mrb[8].mxu0  ;;  %v949_v21 = vadd.f32 %v1578_v4, %v948_v16  ;;  %v1879_v22 = vpop.f32.mrb[8].mxu1 }
 0x106   :  { %v400_v23 = vpop.f32.mrb[9].mxu0  ;;  %v1881_v24 = vpop.f32.mrb[9].mxu1  ;;  %v1022_v39 = vmul.f32 %v1581_v20, %v1581_v20 }
 0x107   :  { %v950_v25 = vadd.f32 %v949_v21, %v400_v23  ;;  %v1020_v26 = vmul.f32 %v400_v23, %v400_v23  ;;  %v1082_v27 = vadd.f32 %v1081_v19, %v1019_v18  ;;  %v1582_v28 = vpop.f32.mrb[10].mxu0  ;;  %v1883_v29 = vpop.f32.mrb[10].mxu1 }
 0x108   :  { %v1352_v30 = vpack.c.bf16 %v1582_v28, %v1581_v20  ;;  %v403_v31 = vpop.f32.mrb[11].mxu0  ;;  %v1432_v32 = vpack.c.bf16 %v1883_v29, %v1879_v22  ;;  %v1887_v33 = vpop.f32.mrb[11].mxu1  ;;  %v1023_v44 = vmul.f32 %v1582_v28, %v1582_v28 }
 0x109   :  { %v1083_v34 = vadd.f32 %v1082_v27, %v1020_v26  ;;  %v1347_v35 = vpack.c.bf16 %v403_v31, %v400_v23  ;;  %v951_v36 = vadd.f32 %v950_v25, %v403_v31  ;;  %v1021_v37 = vmul.f32 %v403_v31, %v403_v31 }
 0x10a   :  { %1488 = vst [vmem:[%s2124_s2 + $0x28] sm:$0xff] %v1352_v30   ;;  %1504 = vst [vmem:[%s2124_s2 + $0xa8] sm:$0xff] %v1432_v32   ;;  %v1427_v38 = vpack.c.bf16 %v1887_v33, %v1881_v24 }
 0x10b   :  { %1487 = vst [vmem:[%s2124_s2 + $0x20] sm:$0xff] %v1347_v35   ;;  %v952_v40 = vadd.f32 %v1581_v20, %v951_v36  ;;  %v1084_v42 = vadd.f32 %v1083_v34, %v1021_v37 }
 0x10c   :  { %1503 = vst [vmem:[%s2124_s2 + $0xa0] sm:$0xff] %v1427_v38  }
 0x10d   :  { %v1085_v46 = vadd.f32 %v1084_v42, %v1022_v39  ;;  %v1585_v47 = vpop.f32.mrb[12].mxu0  ;;  %v953_v48 = vadd.f32 %v1582_v28, %v952_v40  ;;  %v1903_v49 = vpop.f32.mrb[12].mxu1 }
 0x10e   :  { %v416_v51 = vpop.f32.mrb[13].mxu0  ;;  %v1905_v52 = vpop.f32.mrb[13].mxu1  ;;  %v1026_v6 = vmul.f32 %v1585_v47, %v1585_v47 }
 0x10f   :  { %v954_v53 = vadd.f32 %v953_v48, %v416_v51  ;;  %v1024_v54 = vmul.f32 %v416_v51, %v416_v51  ;;  %v1086_v55 = vadd.f32 %v1085_v46, %v1023_v44  ;;  %v1586_v56 = vpop.f32.mrb[14].mxu0  ;;  %v1907_v57 = vpop.f32.mrb[14].mxu1 }
 0x110   :  { %v1362_v58 = vpack.c.bf16 %v1586_v56, %v1585_v47  ;;  %v419_v59 = vpop.f32.mrb[15].mxu0  ;;  %v1442_v60 = vpack.c.bf16 %v1907_v57, %v1903_v49  ;;  %v1911_v61 = vpop.f32.mrb[15].mxu1  ;;  %v1027_v10 = vmul.f32 %v1586_v56, %v1586_v56 }
 0x111   :  { %v1087_v63 = vadd.f32 %v1086_v55, %v1024_v54  ;;  %v1357_v1 = vpack.c.bf16 %v419_v59, %v416_v51  ;;  %v955_v2 = vadd.f32 %v954_v53, %v419_v59  ;;  %v1025_v3 = vmul.f32 %v419_v59, %v419_v59 }
 0x112   :  { %1490 = vst [vmem:[%s2124_s2 + $0x38] sm:$0xff] %v1362_v58   ;;  %1506 = vst [vmem:[%s2124_s2 + $0xb8] sm:$0xff] %v1442_v60   ;;  %v1437_v4 = vpack.c.bf16 %v1911_v61, %v1905_v52 }
 0x113   :  { %1489 = vst [vmem:[%s2124_s2 + $0x30] sm:$0xff] %v1357_v1   ;;  %v956_v7 = vadd.f32 %v1585_v47, %v955_v2  ;;  %v1088_v8 = vadd.f32 %v1087_v63, %v1025_v3 }
 0x114   :  { %1505 = vst [vmem:[%s2124_s2 + $0xb0] sm:$0xff] %v1437_v4  }
 0x115   :  { %v1089_v11 = vadd.f32 %v1088_v8, %v1026_v6  ;;  %v1589_v12 = vpop.f32.mrb[16].mxu0  ;;  %v957_v13 = vadd.f32 %v1586_v56, %v956_v7  ;;  %v1927_v14 = vpop.f32.mrb[16].mxu1 }
 0x116   :  { %v432_v15 = vpop.f32.mrb[17].mxu0  ;;  %v1929_v16 = vpop.f32.mrb[17].mxu1  ;;  %v1030_v35 = vmul.f32 %v1589_v12, %v1589_v12 }
 0x117   :  { %v958_v17 = vadd.f32 %v957_v13, %v432_v15  ;;  %v1028_v18 = vmul.f32 %v432_v15, %v432_v15  ;;  %v1090_v19 = vadd.f32 %v1089_v11, %v1027_v10  ;;  %v1590_v20 = vpop.f32.mrb[18].mxu0  ;;  %v1931_v21 = vpop.f32.mrb[18].mxu1 }
 0x118   :  { %v1372_v23 = vpack.c.bf16 %v1590_v20, %v1589_v12  ;;  %v435_v25 = vpop.f32.mrb[19].mxu0  ;;  %v1452_v26 = vpack.c.bf16 %v1931_v21, %v1927_v14  ;;  %v1935_v27 = vpop.f32.mrb[19].mxu1  ;;  %v1031_v38 = vmul.f32 %v1590_v20, %v1590_v20 }
 0x119   :  { %v1091_v28 = vadd.f32 %v1090_v19, %v1028_v18  ;;  %v1367_v30 = vpack.c.bf16 %v435_v25, %v432_v15  ;;  %v959_v31 = vadd.f32 %v958_v17, %v435_v25  ;;  %v1029_v32 = vmul.f32 %v435_v25, %v435_v25 }
 0x11a   :  { %1492 = vst [vmem:[%s2124_s2 + $0x48] sm:$0xff] %v1372_v23   ;;  %1508 = vst [vmem:[%s2124_s2 + $0xc8] sm:$0xff] %v1452_v26   ;;  %v1447_v34 = vpack.c.bf16 %v1935_v27, %v1929_v16 }
 0x11b   :  { %1491 = vst [vmem:[%s2124_s2 + $0x40] sm:$0xff] %v1367_v30   ;;  %v960_v36 = vadd.f32 %v1589_v12, %v959_v31  ;;  %v1092_v37 = vadd.f32 %v1091_v28, %v1029_v32 }
 0x11c   :  { %1507 = vst [vmem:[%s2124_s2 + $0xc0] sm:$0xff] %v1447_v34  }
 0x11d   :  { %v1093_v39 = vadd.f32 %v1092_v37, %v1030_v35  ;;  %v1593_v40 = vpop.f32.mrb[20].mxu0  ;;  %v961_v42 = vadd.f32 %v1590_v20, %v960_v36  ;;  %v1951_v44 = vpop.f32.mrb[20].mxu1 }
 0x11e   :  { %v448_v46 = vpop.f32.mrb[21].mxu0  ;;  %v1953_v47 = vpop.f32.mrb[21].mxu1  ;;  %v1034_v6 = vmul.f32 %v1593_v40, %v1593_v40 }
 0x11f   :  { %v962_v48 = vadd.f32 %v961_v42, %v448_v46  ;;  %v1032_v51 = vmul.f32 %v448_v46, %v448_v46  ;;  %v1094_v53 = vadd.f32 %v1093_v39, %v1031_v38  ;;  %v1594_v54 = vpop.f32.mrb[22].mxu0  ;;  %v1955_v55 = vpop.f32.mrb[22].mxu1 }
 0x120   :  { %v1382_v56 = vpack.c.bf16 %v1594_v54, %v1593_v40  ;;  %v451_v58 = vpop.f32.mrb[23].mxu0  ;;  %v1462_v59 = vpack.c.bf16 %v1955_v55, %v1951_v44  ;;  %v1959_v60 = vpop.f32.mrb[23].mxu1  ;;  %v1035_v10 = vmul.f32 %v1594_v54, %v1594_v54 }
 0x121   :  { %v1095_v63 = vadd.f32 %v1094_v53, %v1032_v51  ;;  %v1377_v1 = vpack.c.bf16 %v451_v58, %v448_v46  ;;  %v963_v2 = vadd.f32 %v962_v48, %v451_v58  ;;  %v1033_v3 = vmul.f32 %v451_v58, %v451_v58 }
 0x122   :  { %1494 = vst [vmem:[%s2124_s2 + $0x58] sm:$0xff] %v1382_v56   ;;  %1510 = vst [vmem:[%s2124_s2 + $0xd8] sm:$0xff] %v1462_v59   ;;  %v1457_v4 = vpack.c.bf16 %v1959_v60, %v1953_v47 }
 0x123   :  { %1493 = vst [vmem:[%s2124_s2 + $0x50] sm:$0xff] %v1377_v1   ;;  %v964_v7 = vadd.f32 %v1593_v40, %v963_v2  ;;  %v1096_v8 = vadd.f32 %v1095_v63, %v1033_v3 }
 0x124   :  { %1509 = vst [vmem:[%s2124_s2 + $0xd0] sm:$0xff] %v1457_v4  }
 0x125   :  { %v1097_v11 = vadd.f32 %v1096_v8, %v1034_v6  ;;  %v1597_v12 = vpop.f32.mrb[24].mxu0  ;;  %v965_v13 = vadd.f32 %v1594_v54, %v964_v7  ;;  %v1975_v15 = vpop.f32.mrb[24].mxu1 }
 0x126   :  { %v464_v17 = vpop.f32.mrb[25].mxu0  ;;  %v1977_v18 = vpop.f32.mrb[25].mxu1  ;;  %v1038_v39 = vmul.f32 %v1597_v12, %v1597_v12 }
 0x127   :  { %v966_v19 = vadd.f32 %v965_v13, %v464_v17  ;;  %v1036_v20 = vmul.f32 %v464_v17, %v464_v17  ;;  %v1098_v23 = vadd.f32 %v1097_v11, %v1035_v10  ;;  %v1598_v25 = vpop.f32.mrb[26].mxu0  ;;  %v1979_v26 = vpop.f32.mrb[26].mxu1 }
 0x128   :  { %v1392_v28 = vpack.c.bf16 %v1598_v25, %v1597_v12  ;;  %v467_v30 = vpop.f32.mrb[27].mxu0  ;;  %v1472_v31 = vpack.c.bf16 %v1979_v26, %v1975_v15  ;;  %v1983_v32 = vpop.f32.mrb[27].mxu1  ;;  %v1039_v46 = vmul.f32 %v1598_v25, %v1598_v25 }
 0x129   :  { %v1099_v34 = vadd.f32 %v1098_v23, %v1036_v20  ;;  %v1387_v35 = vpack.c.bf16 %v467_v30, %v464_v17  ;;  %v967_v36 = vadd.f32 %v966_v19, %v467_v30  ;;  %v1037_v37 = vmul.f32 %v467_v30, %v467_v30 }
 0x12a   :  { %1496 = vst [vmem:[%s2124_s2 + $0x68] sm:$0xff] %v1392_v28   ;;  %1512 = vst [vmem:[%s2124_s2 + $0xe8] sm:$0xff] %v1472_v31   ;;  %v1467_v38 = vpack.c.bf16 %v1983_v32, %v1977_v18  ;;  %v1044_v31 = vmul.f32 %v1833_v43, %v1833_v43 }
 0x12b   :  { %1495 = vst [vmem:[%s2124_s2 + $0x60] sm:$0xff] %v1387_v35   ;;  %v968_v40 = vadd.f32 %v1597_v12, %v967_v36  ;;  %v1100_v42 = vadd.f32 %v1099_v34, %v1037_v37 }
 0x12c   :  { %1511 = vst [vmem:[%s2124_s2 + $0xe0] sm:$0xff] %v1467_v38   ;;  %v1045_v38 = vmul.f32 %v1839_v50, %v1839_v50 }
 0x12d   :  { %v1101_v48 = vadd.f32 %v1100_v42, %v1038_v39  ;;  %v1601_v51 = vpop.f32.mrb[28].mxu0  ;;  %v969_v53 = vadd.f32 %v1598_v25, %v968_v40  ;;  %v1999_v54 = vpop.f32.mrb[28].mxu1  ;;  %v1046_v39 = vmul.f32 %v1831_v41, %v1831_v41 }
 0x12e   :  { %v480_v56 = vpop.f32.mrb[29].mxu0  ;;  %v2001_v58 = vpop.f32.mrb[29].mxu1  ;;  %v1042_v19 = vmul.f32 %v1601_v51, %v1601_v51 }
 0x12f   :  { %v970_v59 = vadd.f32 %v969_v53, %v480_v56  ;;  %v1040_v63 = vmul.f32 %v480_v56, %v480_v56  ;;  %v1102_v1 = vadd.f32 %v1101_v48, %v1039_v46  ;;  %v1602_v2 = vpop.f32.mrb[30].mxu0  ;;  %v2003_v3 = vpop.f32.mrb[30].mxu1  ;;  %v1047_v46 = vmul.f32 %v1835_v45, %v1835_v45 }
 0x130   :  { %v1402_v4 = vpack.c.bf16 %v1602_v2, %v1601_v51  ;;  %v483_v6 = vpop.f32.mrb[31].mxu0  ;;  %v1482_v7 = vpack.c.bf16 %v2003_v3, %v1999_v54  ;;  %v2007_v8 = vpop.f32.mrb[31].mxu1  ;;  %v1043_v25 = vmul.f32 %v1602_v2, %v1602_v2 }
 0x131   :  { %v1103_v10 = vadd.f32 %v1102_v1, %v1040_v63  ;;  %v1397_v11 = vpack.c.bf16 %v483_v6, %v480_v56  ;;  %v971_v12 = vadd.f32 %v970_v59, %v483_v6  ;;  %v1041_v13 = vmul.f32 %v483_v6, %v483_v6 }
 0x132   :  { %1498 = vst [vmem:[%s2124_s2 + $0x78] sm:$0xff] %v1402_v4   ;;  %1514 = vst [vmem:[%s2124_s2 + $0xf8] sm:$0xff] %v1482_v7   ;;  %v1477_v17 = vpack.c.bf16 %v2007_v8, %v2001_v58  ;;  %v1049_v63 = vmul.f32 %v1863_v9, %v1863_v9 }
 0x133   :  { %1497 = vst [vmem:[%s2124_s2 + $0x70] sm:$0xff] %v1397_v11   ;;  %v972_v20 = vadd.f32 %v1601_v51, %v971_v12  ;;  %v1104_v23 = vadd.f32 %v1103_v10, %v1041_v13  ;;  %v1053_v12 = vmul.f32 %v1887_v33, %v1887_v33 }
 0x134   :  { %1513 = vst [vmem:[%s2124_s2 + $0xf0] sm:$0xff] %v1477_v17  }
 0x135   :  { %v1105_v28 = vadd.f32 %v1104_v23, %v1042_v19  ;;  %v973_v30 = vadd.f32 %v1602_v2, %v972_v20 }
 0x137   :  { %v974_v34 = vadd.f32 %v973_v30, %v1833_v43  ;;  %v1106_v35 = vadd.f32 %v1105_v28, %v1043_v25  ;;  %v1048_v43 = vmul.f32 %v1857_v0, %v1857_v0  ;;  %v1057_v30 = vmul.f32 %v1911_v61, %v1911_v61 }
 0x139   :  { %v1107_v36 = vadd.f32 %v1106_v35, %v1044_v31  ;;  %v975_v37 = vadd.f32 %v974_v34, %v1839_v50 }
 0x13b   :  { %v976_v40 = vadd.f32 %v1831_v41, %v975_v37  ;;  %v1108_v42 = vadd.f32 %v1107_v36, %v1045_v38  ;;  %v1050_v41 = vmul.f32 %v1855_v62, %v1855_v62 }
 0x13d   :  { %v1109_v48 = vadd.f32 %v1108_v42, %v1046_v39  ;;  %v977_v51 = vadd.f32 %v1835_v45, %v976_v40  ;;  %v1051_v45 = vmul.f32 %v1859_v5, %v1859_v5  ;;  %v1061_v40 = vmul.f32 %v1935_v27, %v1935_v27 }
 0x13f   :  { %v978_v53 = vadd.f32 %v977_v51, %v1857_v0  ;;  %v1110_v56 = vadd.f32 %v1109_v48, %v1047_v46  ;;  %v1052_v0 = vmul.f32 %v1881_v24, %v1881_v24 }
 0x141   :  { %v1111_v59 = vadd.f32 %v1110_v56, %v1048_v43  ;;  %v979_v50 = vadd.f32 %v978_v53, %v1863_v9 }
 0x143   :  { %v980_v1 = vadd.f32 %v1855_v62, %v979_v50  ;;  %v1112_v2 = vadd.f32 %v1111_v59, %v1049_v63  ;;  %v1054_v62 = vmul.f32 %v1879_v22, %v1879_v22  ;;  %v1065_v59 = vmul.f32 %v1959_v60, %v1959_v60 }
 0x145   :  { %v1113_v4 = vadd.f32 %v1112_v2, %v1050_v41  ;;  %v981_v6 = vadd.f32 %v1859_v5, %v980_v1  ;;  %v1055_v5 = vmul.f32 %v1883_v29, %v1883_v29 }
 0x147   :  { %v982_v7 = vadd.f32 %v981_v6, %v1881_v24  ;;  %v1114_v10 = vadd.f32 %v1113_v4, %v1051_v45  ;;  %v1056_v24 = vmul.f32 %v1905_v52, %v1905_v52  ;;  %v1069_v6 = vmul.f32 %v1983_v32, %v1983_v32 }
 0x149   :  { %v1115_v11 = vadd.f32 %v1114_v10, %v1052_v0  ;;  %v983_v9 = vadd.f32 %v982_v7, %v1887_v33 }
 0x14b   :  { %v984_v13 = vadd.f32 %v1879_v22, %v983_v9  ;;  %v1116_v17 = vadd.f32 %v1115_v11, %v1053_v12  ;;  %v1058_v22 = vmul.f32 %v1903_v49, %v1903_v49 }
 0x14d   :  { %v1117_v19 = vadd.f32 %v1116_v17, %v1054_v62  ;;  %v985_v20 = vadd.f32 %v1883_v29, %v984_v13  ;;  %v1059_v29 = vmul.f32 %v1907_v57, %v1907_v57  ;;  %v1073_v13 = vmul.f32 %v2007_v8, %v2007_v8 }
 0x14f   :  { %v986_v23 = vadd.f32 %v985_v20, %v1905_v52  ;;  %v1118_v25 = vadd.f32 %v1117_v19, %v1055_v5  ;;  %v1060_v52 = vmul.f32 %v1929_v16, %v1929_v16 }
 0x151   :  { %v1119_v28 = vadd.f32 %v1118_v25, %v1056_v24  ;;  %v987_v33 = vadd.f32 %v986_v23, %v1911_v61 }
 0x153   :  { %v988_v31 = vadd.f32 %v1903_v49, %v987_v33  ;;  %v1120_v34 = vadd.f32 %v1119_v28, %v1057_v30  ;;  %v1062_v49 = vmul.f32 %v1927_v14, %v1927_v14 }
 0x155   :  { %v1121_v35 = vadd.f32 %v1120_v34, %v1058_v22  ;;  %v989_v36 = vadd.f32 %v1907_v57, %v988_v31  ;;  %v1063_v57 = vmul.f32 %v1931_v21, %v1931_v21 }
 0x157   :  { %v990_v37 = vadd.f32 %v989_v36, %v1929_v16  ;;  %v1122_v38 = vadd.f32 %v1121_v35, %v1059_v29  ;;  %v1064_v16 = vmul.f32 %v1953_v47, %v1953_v47 }
 0x159   :  { %v1123_v39 = vadd.f32 %v1122_v38, %v1060_v52  ;;  %v991_v61 = vadd.f32 %v990_v37, %v1935_v27 }
 0x15b   :  { %v992_v42 = vadd.f32 %v1927_v14, %v991_v61  ;;  %v1124_v46 = vadd.f32 %v1123_v39, %v1061_v40  ;;  %v1066_v14 = vmul.f32 %v1951_v44, %v1951_v44 }
 0x15d   :  { %v1125_v48 = vadd.f32 %v1124_v46, %v1062_v49  ;;  %v993_v51 = vadd.f32 %v1931_v21, %v992_v42  ;;  %v1067_v21 = vmul.f32 %v1955_v55, %v1955_v55 }
 0x15f   :  { %v994_v43 = vadd.f32 %v993_v51, %v1953_v47  ;;  %v1126_v53 = vadd.f32 %v1125_v48, %v1063_v57  ;;  %v1068_v47 = vmul.f32 %v1977_v18, %v1977_v18 }
 0x161   :  { %v1127_v56 = vadd.f32 %v1126_v53, %v1064_v16  ;;  %v995_v27 = vadd.f32 %v994_v43, %v1959_v60 }
 0x163   :  { %v996_v50 = vadd.f32 %v1951_v44, %v995_v27  ;;  %v1128_v63 = vadd.f32 %v1127_v56, %v1065_v59  ;;  %v1070_v44 = vmul.f32 %v1975_v15, %v1975_v15 }
 0x165   :  { %v1129_v41 = vadd.f32 %v1128_v63, %v1066_v14  ;;  %v997_v1 = vadd.f32 %v1955_v55, %v996_v50  ;;  %v1071_v55 = vmul.f32 %v1979_v26, %v1979_v26 }
 0x167   :  { %v998_v2 = vadd.f32 %v997_v1, %v1977_v18  ;;  %v1130_v45 = vadd.f32 %v1129_v41, %v1067_v21  ;;  %v1072_v18 = vmul.f32 %v2001_v58, %v2001_v58 }
 0x169   :  { %v1131_v4 = vadd.f32 %v1130_v45, %v1068_v47  ;;  %v999_v60 = vadd.f32 %v998_v2, %v1983_v32 }
 0x16b   :  { %v1000_v0 = vadd.f32 %v1975_v15, %v999_v60  ;;  %v1132_v7 = vadd.f32 %v1131_v4, %v1069_v6  ;;  %v1074_v15 = vmul.f32 %v1999_v54, %v1999_v54 }
 0x16d   :  { %v1133_v10 = vadd.f32 %v1132_v7, %v1070_v44  ;;  %v1001_v11 = vadd.f32 %v1979_v26, %v1000_v0  ;;  %v1075_v26 = vmul.f32 %v2003_v3, %v2003_v3 }
 0x16f   :  { %v1002_v9 = vadd.f32 %v1001_v11, %v2001_v58  ;;  %v1134_v12 = vadd.f32 %v1133_v10, %v1071_v55 }
 0x171   :  { %v1135_v62 = vadd.f32 %v1134_v12, %v1072_v18  ;;  %v1003_v32 = vadd.f32 %v1002_v9, %v2007_v8 }
 0x173   :  { %v1004_v17 = vadd.f32 %v1999_v54, %v1003_v32  ;;  %v1136_v5 = vadd.f32 %v1135_v62, %v1073_v13 }
 0x175   :  { %v1005_v19 = vadd.f32 %v2003_v3, %v1004_v17  ;;  %v1137_v20 = vadd.f32 %v1136_v5, %v1074_v15 }
 0x177   :  { %v1006_v58 = vrot.slane %v1005_v19, 4  ;;  %v1138_v24 = vadd.f32 %v1137_v20, %v1075_v26 }
 0x179   :  { %v1007_v23 = vadd.f32 %v1006_v58, %v1005_v19  ;;  %v1139_v25 = vrot.slane %v1138_v24, 4 }
 0x17b   :  { %v1008_v28 = vrot.slane %v1007_v23, 2  ;;  %v1140_v33 = vadd.f32 %v1139_v25, %v1138_v24 }
 0x17d   :  { %v1009_v30 = vadd.f32 %v1008_v28, %v1007_v23  ;;  %v1141_v8 = vrot.slane %v1140_v33, 2 }
 0x17f   :  { %v1010_v22 = vrot.slane %v1009_v30, 1  ;;  %v1142_v31 = vadd.f32 %v1141_v8, %v1140_v33 }
 0x181   :  { %v1143_v34 = vrot.slane %v1142_v31, 1  ;;  %v1011_v54 = vadd.f32 %v1010_v22, %v1009_v30 }
 0x183   :  { %v1144_v29 = vadd.f32 %v1143_v34, %v1142_v31 }
 0x185   :  { %v1146_v35 = vsel %vm1145_vm0, %v1011_v54, %v1144_v29 }
 0x186   :  { %1147 = vst [vmem:[%s2125_s3] sm:$0x3] %v1146_v35 }

// kernel: extra_res_module_forward.7
= control target key start
LH: loop header
LB: loop body
LE: loop exit
PB: predicated region body
PF: predicated region fallthrough
CT: control target
= control target key end

     0   :  { %v48_v1 = vlaneseq  ;;  %s499_s0 = inlined_call_operand.vmem [shape: bf16[128,128], index: 0, kind: input, shape index: {}]   ;;  %s500_s1 = inlined_call_operand.vmem [shape: bf16[128,128], index: 1, kind: input, shape index: {}]   ;;  %s501_s2 = inlined_call_operand.vmem [shape: f32[4,128], index: 2, kind: input, shape index: {}]   ;;  %s502_s3 = inlined_call_operand.hbm [shape: f32[128,128], index: 3, kind: output, shape index: {}]  }
   0x1   :  { %v225_v0 = vld [vmem:[%s499_s0] sm:$0xff]   ;;  %v288_v7 = vld [vmem:[%s499_s0 + $0x8] sm:$0xff]   ;;  %v289_v9 = vld [vmem:[%s499_s0 + $0x10] sm:$0xff]  }
   0x2   :  { %v257_v2 = vld [vmem:[%s500_s1] sm:$0xff]   ;;  %v226_v3 = vunpack.c.l.bf16 %v225_v0  ;;  %v227_v5 = vunpack.c.h.bf16 %v225_v0  ;;  %v295_v8 = vld [vmem:[%s500_s1 + $0x8] sm:$0xff]   ;;  %v49_v10 = vshrl.u32 %v48_v1, 7  ;;  %v230_v11 = vunpack.c.l.bf16 %v288_v7  ;;  %v296_v14 = vld [vmem:[%s500_s1 + $0x10] sm:$0xff]  }
   0x3   :  { %v258_v4 = vunpack.c.l.bf16 %v257_v2  ;;  %v259_v6 = vunpack.c.h.bf16 %v257_v2  ;;  %v262_v12 = vunpack.c.l.bf16 %v295_v8  ;;  %v231_v13 = vunpack.c.h.bf16 %v288_v7  ;;  %v290_v15 = vld [vmem:[%s499_s0 + $0x18] sm:$0xff]   ;;  %v15_v17 = vld [vmem:[%s501_s2] sm:$0xf] }
   0x4   :  { %v376_v16 = vld [vmem:[%s500_s1 + $0x18] sm:$0xff]   ;;  %v263_v18 = vunpack.c.h.bf16 %v295_v8  ;;  %v234_v19 = vunpack.c.l.bf16 %v289_v9  ;;  %v266_v20 = vunpack.c.l.bf16 %v296_v14  ;;  %v235_v21 = vunpack.c.h.bf16 %v289_v9  ;;  %v384_v26 = vld [vmem:[%s499_s0 + $0x20] sm:$0xff]  }
   0x5   :  { %v50_v22 = vsub.s32 0, %v49_v10  ;;  %v70_v23 = vsub.s32 1, %v49_v10  ;;  %v122_v24 = vsub.s32 2, %v49_v10  ;;  %v158_v25 = vsub.s32 3, %v49_v10  ;;  %v389_v27 = vld [vmem:[%s500_s1 + $0x20] sm:$0xff]  }
   0x6   :  { %v267_v28 = vunpack.c.h.bf16 %v296_v14  ;;  %v238_v29 = vunpack.c.l.bf16 %v290_v15  ;;  %v270_v30 = vunpack.c.l.bf16 %v376_v16  ;;  %v239_v31 = vunpack.c.h.bf16 %v290_v15 }
   0x7   :  { %v392_v32 = vrot.slane %v15_v17, %v50_v22  ;;  %v394_v33 = vrot.slane %v15_v17, %v70_v23  ;;  %v396_v34 = vrot.slane %v15_v17, %v122_v24  ;;  %v398_v35 = vrot.slane %v15_v17, %v158_v25 }
   0x8   :  { %8 = vsyncpa [#allocation3], 0  ;;  %v271_v36 = vunpack.c.h.bf16 %v376_v16  ;;  %v242_v37 = vunpack.c.l.bf16 %v384_v26  ;;  %v274_v38 = vunpack.c.l.bf16 %v389_v27  ;;  %v243_v39 = vunpack.c.h.bf16 %v384_v26  ;;  %v292_v16 = vld [vmem:[%s499_s0 + $0x28] sm:$0xff]  }
   0x9   :  { %v52_v40 = vmul.f32 %v226_v3, %v392_v32  ;;  %v124_v41 = vmul.f32 %v258_v4, %v396_v34  ;;  %v53_v42 = vmul.f32 %v227_v5, %v392_v32  ;;  %v125_v43 = vmul.f32 %v259_v6, %v396_v34 }
   0xa   :  { %v54_v44 = vmul.f32 %v230_v11, %v392_v32  ;;  %v126_v45 = vmul.f32 %v262_v12, %v396_v34  ;;  %v55_v46 = vmul.f32 %v231_v13, %v392_v32  ;;  %v127_v47 = vmul.f32 %v263_v18, %v396_v34 }
   0xb   :  { %v72_v48 = vadd.f32 %v394_v33, %v52_v40  ;;  %v73_v49 = vadd.f32 %v394_v33, %v53_v42  ;;  %v56_v50 = vmul.f32 %v234_v19, %v392_v32  ;;  %v128_v51 = vmul.f32 %v266_v20, %v396_v34 }
   0xc   :  { %v74_v52 = vadd.f32 %v394_v33, %v54_v44  ;;  %v75_v53 = vadd.f32 %v394_v33, %v55_v46  ;;  %v57_v54 = vmul.f32 %v235_v21, %v392_v32  ;;  %v129_v55 = vmul.f32 %v267_v28, %v396_v34  ;;  %v299_v21 = vld [vmem:[%s500_s1 + $0x28] sm:$0xff]  }
   0xd   :  { %v140_v56 = vadd.f32 %v124_v41, %v72_v48  ;;  %v141_v57 = vadd.f32 %v125_v43, %v73_v49  ;;  %v76_v58 = vadd.f32 %v394_v33, %v56_v50  ;;  %v58_v59 = vmul.f32 %v238_v29, %v392_v32  ;;  %v300_v43 = vld [vmem:[%s500_s1 + $0x30] sm:$0xff]  }
   0xe   :  { %v142_v60 = vadd.f32 %v126_v45, %v74_v52  ;;  %v143_v61 = vadd.f32 %v127_v47, %v75_v53  ;;  %v77_v62 = vadd.f32 %v394_v33, %v57_v54  ;;  %v130_v63 = vmul.f32 %v270_v30, %v396_v34 }
   0xf   :  { %v160_v0 = vadd.f32 %v398_v35, %v140_v56  ;;  %v161_v1 = vadd.f32 %v398_v35, %v141_v57  ;;  %v144_v2 = vadd.f32 %v128_v51, %v76_v58  ;;  %v78_v3 = vadd.f32 %v394_v33, %v58_v59  ;;  %v294_v56 = vld [vmem:[%s499_s0 + $0x38] sm:$0xff]  }
  0x10   :  { %v162_v4 = vadd.f32 %v398_v35, %v142_v60  ;;  %v163_v5 = vadd.f32 %v398_v35, %v143_v61  ;;  %v145_v6 = vadd.f32 %v129_v55, %v77_v62  ;;  %v59_v7 = vmul.f32 %v239_v31, %v392_v32  ;;  %v293_v31 = vld [vmem:[%s499_s0 + $0x30] sm:$0xff]   ;;  %v301_v61 = vld [vmem:[%s500_s1 + $0x38] sm:$0xff]   ;;  %s329_s0 = smov [#allocation2]  }
  0x11   :  { %v176_v8 = vmax.f32 %v160_v0, 0.0  ;;  %v177_v9 = vmax.f32 %v161_v1, 0.0  ;;  %v164_v10 = vadd.f32 %v398_v35, %v144_v2  ;;  %v146_v11 = vadd.f32 %v130_v63, %v78_v3  ;;  %s213_s1 = sshll.u32 %s329_s0, 4  ;;  %s214_s1 = int_to_ptr.vmem [resolvable:$true] %s213_s1 }
  0x12   :  { %v178_v12 = vmax.f32 %v162_v4, 0.0  ;;  %v179_v13 = vmax.f32 %v163_v5, 0.0  ;;  %v165_v14 = vadd.f32 %v398_v35, %v145_v6  ;;  %v79_v15 = vadd.f32 %v394_v33, %v59_v7  ;;  %s305_s18 = scalar_lea.vmem %s214_s1, 2048  ;;  %p310_p1 = scmp.lt.s32.totalorder %s214_s1, %s214_s1 }
  0x13   :  { %192 = vst [vmem:[#allocation2] sm:$0xff] %v176_v8  ;;  %193 = vst [vmem:[#allocation2 + $0x8] sm:$0xff] %v177_v9  ;;  %v180_v17 = vmax.f32 %v164_v10, 0.0  ;;  %v166_v18 = vadd.f32 %v398_v35, %v146_v11  ;;  %v131_v19 = vmul.f32 %v271_v36, %v396_v34  ;;  %v60_v20 = vmul.f32 %v242_v37, %v392_v32  ;;  %p306_p0 = scmp.ne.s32.totalorder %s214_s1, %s305_s18  ;;  %p311_p2 = scmp.lt.s32.totalorder %s305_s18, %s305_s18 }
  0x14   :  { %194 = vst [vmem:[#allocation2 + $0x10] sm:$0xff] %v178_v12  ;;  %195 = vst [vmem:[#allocation2 + $0x18] sm:$0xff] %v179_v13  ;;  %v181_v22 = vmax.f32 %v165_v14, 0.0  ;;  %v132_v23 = vmul.f32 %v274_v38, %v396_v34  ;;  %v61_v24 = vmul.f32 %v243_v39, %v392_v32  ;;  %v275_v25 = vunpack.c.h.bf16 %v389_v27 }
  0x15   :  { %196 = vst [vmem:[#allocation2 + $0x20] sm:$0xff] %v180_v17  ;;  %v182_v26 = vmax.f32 %v166_v18, 0.0  ;;  %v147_v28 = vadd.f32 %v131_v19, %v79_v15  ;;  %v80_v29 = vadd.f32 %v394_v33, %v60_v20  ;;  %v246_v30 = vunpack.c.l.bf16 %v292_v16  ;;  %p312_p3 = por %p311_p2, %p310_p1 }
  0x16   :  { %197 = vst [vmem:[#allocation2 + $0x28] sm:$0xff] %v181_v22  ;;  %v81_v36 = vadd.f32 %v394_v33, %v61_v24  ;;  %v133_v37 = vmul.f32 %v275_v25, %v396_v34  ;;  %v278_v38 = vunpack.c.l.bf16 %v299_v21  ;;  %v247_v40 = vunpack.c.h.bf16 %v292_v16 }
  0x17   :  { %198 = vst [vmem:[#allocation2 + $0x30] sm:$0xff] %v182_v26  ;;  %v167_v27 = vadd.f32 %v398_v35, %v147_v28  ;;  %v148_v39 = vadd.f32 %v132_v23, %v80_v29  ;;  %v62_v41 = vmul.f32 %v246_v30, %v392_v32  ;;  %v279_v42 = vunpack.c.h.bf16 %v299_v21  ;;  %p313_p4 = pnand %p312_p3, %p306_p0 }
  0x18   :  { %v149_v44 = vadd.f32 %v133_v37, %v81_v36  ;;  %v134_v45 = vmul.f32 %v278_v38, %v396_v34  ;;  %v63_v46 = vmul.f32 %v247_v40, %v392_v32  ;;  %v250_v47 = vunpack.c.l.bf16 %v293_v31 }
  0x19   :  { %v183_v48 = vmax.f32 %v167_v27, 0.0  ;;  %v168_v49 = vadd.f32 %v398_v35, %v148_v39  ;;  %v82_v50 = vadd.f32 %v394_v33, %v62_v41  ;;  %v135_v51 = vmul.f32 %v279_v42, %v396_v34 }
  0x1a   :  { %v169_v52 = vadd.f32 %v398_v35, %v149_v44  ;;  %v83_v53 = vadd.f32 %v394_v33, %v63_v46  ;;  %v64_v54 = vmul.f32 %v250_v47, %v392_v32  ;;  %v282_v55 = vunpack.c.l.bf16 %v300_v43 }
  0x1b   :  { %199 = vst [vmem:[#allocation2 + $0x38] sm:$0xff] %v183_v48  ;;  %v184_v57 = vmax.f32 %v168_v49, 0.0  ;;  %v150_v58 = vadd.f32 %v134_v45, %v82_v50  ;;  %v251_v59 = vunpack.c.h.bf16 %v293_v31  ;;  %v283_v60 = vunpack.c.h.bf16 %v300_v43 }
  0x1c   :  { %v185_v62 = vmax.f32 %v169_v52, 0.0  ;;  %v151_v63 = vadd.f32 %v135_v51, %v83_v53  ;;  %v84_v0 = vadd.f32 %v394_v33, %v64_v54  ;;  %v136_v1 = vmul.f32 %v282_v55, %v396_v34 }
  0x1d   :  { %200 = vst [vmem:[#allocation2 + $0x40] sm:$0xff] %v184_v57  ;;  %v170_v2 = vadd.f32 %v398_v35, %v150_v58  ;;  %v65_v3 = vmul.f32 %v251_v59, %v392_v32  ;;  %v137_v4 = vmul.f32 %v283_v60, %v396_v34  ;;  %v254_v5 = vunpack.c.l.bf16 %v294_v56 }
  0x1e   :  { %201 = vst [vmem:[#allocation2 + $0x48] sm:$0xff] %v185_v62  ;;  %v171_v6 = vadd.f32 %v398_v35, %v151_v63  ;;  %v152_v7 = vadd.f32 %v136_v1, %v84_v0  ;;  %v286_v8 = vunpack.c.l.bf16 %v301_v61  ;;  %v255_v9 = vunpack.c.h.bf16 %v294_v56 }
  0x1f   :  { %v186_v10 = vmax.f32 %v170_v2, 0.0  ;;  %v85_v11 = vadd.f32 %v394_v33, %v65_v3  ;;  %v66_v12 = vmul.f32 %v254_v5, %v392_v32  ;;  %v287_v13 = vunpack.c.h.bf16 %v301_v61 }
  0x20   :  { %v187_v14 = vmax.f32 %v171_v6, 0.0  ;;  %v172_v15 = vadd.f32 %v398_v35, %v152_v7  ;;  %v138_v16 = vmul.f32 %v286_v8, %v396_v34  ;;  %v67_v17 = vmul.f32 %v255_v9, %v392_v32 }
  0x21   :  { %202 = vst [vmem:[#allocation2 + $0x50] sm:$0xff] %v186_v10  ;;  %v153_v18 = vadd.f32 %v137_v4, %v85_v11  ;;  %v86_v19 = vadd.f32 %v394_v33, %v66_v12  ;;  %v139_v20 = vmul.f32 %v287_v13, %v396_v34 }
  0x22   :  { %203 = vst [vmem:[#allocation2 + $0x58] sm:$0xff] %v187_v14  ;;  %v188_v21 = vmax.f32 %v172_v15, 0.0  ;;  %v87_v22 = vadd.f32 %v394_v33, %v67_v17 }
  0x23   :  { %v173_v23 = vadd.f32 %v398_v35, %v153_v18  ;;  %v154_v24 = vadd.f32 %v138_v16, %v86_v19 }
  0x24   :  { %204 = vst [vmem:[#allocation2 + $0x60] sm:$0xff] %v188_v21  ;;  %v155_v25 = vadd.f32 %v139_v20, %v87_v22 }
  0x25   :  { %v189_v26 = vmax.f32 %v173_v23, 0.0  ;;  %v174_v28 = vadd.f32 %v398_v35, %v154_v24 }
  0x26   :  { %v175_v32 = vadd.f32 %v398_v35, %v155_v25 }
  0x27   :  { %205 = vst [vmem:[#allocation2 + $0x68] sm:$0xff] %v189_v26  ;;  %v190_v29 = vmax.f32 %v174_v28, 0.0 }
  0x28   :  { %v191_v30 = vmax.f32 %v175_v32, 0.0 }
  0x29   :  { %206 = vst [vmem:[#allocation2 + $0x70] sm:$0xff] %v190_v29 }
  0x2a   :  { %207 = vst [vmem:[#allocation2 + $0x78] sm:$0xff] %v191_v30 }
  0x2b   :  { %316 = shalt.err (!%p313_p4)
}
  0x2c   :  { %s317_s21 = scalar_lea.hbm %s502_s3, 2048 }
  0x2d   :  { %p318_p5 = scmp.ne.s32.totalorder %s502_s3, %s317_s21  ;;  %p321_p6 = scmp.lt.u32.totalorder %s317_s21, %s502_s3 }
  0x2f   :  { %p323_p7 = pnand %p321_p6, %p318_p5 }
  0x31   :  { %326 = shalt.err (!%p323_p7)
}
  0x32   :  { %s330_s26 = smov 128   ;;  %s331_s27 = smov 8  }
  0x33   :  { %219 = dma.vmem_to_hbm [thread:$0]  %s214_s1, 2048, %s502_s3, [#allocation3], %s330_s26, %s330_s26, %s331_s27  }
  0x34   :  { %327 = dma.done.wait [#allocation3], 2048  }
  0x35   :  { %328 = vsyncadd [#allocation3], 4294965248 }
  0x36   :  { %223 = vsyncpa [#allocation3], 1 }

// kernel: extra_res_module_forward.5
= control target key start
LH: loop header
LB: loop body
LE: loop exit
PB: predicated region body
PF: predicated region fallthrough
CT: control target
= control target key end

     0   :  { %vm1661_vm0 = vcmask 1040384   ;;  %s2966_s1 = inlined_call_operand.vmem [shape: bf16[1152,128], index: 1, kind: input, shape index: {}]   ;;  %s2967_s0 = inlined_call_operand.vmem [shape: bf16[128,1152], index: 0, kind: input, shape index: {}]   ;;  %s2968_s2 = inlined_call_operand.vmem [shape: bf16[128,128], index: 2, kind: output, shape index: {0}]   ;;  %s2969_s3 = inlined_call_operand.vmem [shape: f32[1,2,128], index: 3, kind: output, shape index: {1}]  }
   0x1   :  { %v2215_v0 = vld [vmem:[%s2966_s1 + $0x40] sm:$0xff]   ;;  %v2219_v4 = vld [vmem:[%s2966_s1 + $0x48] sm:$0xff]   ;;  %v2223_v8 = vld [vmem:[%s2966_s1 + $0x50] sm:$0xff]  }
   0x2   :  { %v2216_v1 = vld [vmem:[%s2966_s1 + $0xc0] sm:$0xff]   ;;  %1895 = vmatprep.subr.bf16.mxu0 %v2215_v0  ;;  %v2220_v5 = vld [vmem:[%s2966_s1 + $0xc8] sm:$0xff]   ;;  %v2224_v9 = vld [vmem:[%s2966_s1 + $0xd0] sm:$0xff]  }
   0x3   :  { %v2217_v2 = vld [vmem:[%s2966_s1] sm:$0xff]   ;;  %1959 = vmatprep.subr.bf16.mxu1 %v2216_v1  ;;  %v2221_v6 = vld [vmem:[%s2966_s1 + $0x8] sm:$0xff]   ;;  %v2225_v10 = vld [vmem:[%s2966_s1 + $0x10] sm:$0xff]  }
   0x4   :  { %v2218_v3 = vld [vmem:[%s2966_s1 + $0x80] sm:$0xff]   ;;  %1896 = vmatpush3.bf16.msra.mxu0 %v2217_v2  ;;  %v2222_v7 = vld [vmem:[%s2966_s1 + $0x88] sm:$0xff]   ;;  %v2226_v11 = vld [vmem:[%s2966_s1 + $0x90] sm:$0xff]  }
   0x5   :  { %1960 = vmatpush3.bf16.msra.mxu1 %v2218_v3  ;;  %1897 = vmatprep.subr.bf16.mxu0 %v2219_v4  ;;  %v2227_v12 = vld [vmem:[%s2966_s1 + $0x58] sm:$0xff]   ;;  %v2231_v16 = vld [vmem:[%s2966_s1 + $0x60] sm:$0xff]   ;;  %v2235_v20 = vld [vmem:[%s2966_s1 + $0x68] sm:$0xff]  }
   0x6   :  { %1961 = vmatprep.subr.bf16.mxu1 %v2220_v5  ;;  %v2228_v13 = vld [vmem:[%s2966_s1 + $0xd8] sm:$0xff]   ;;  %v2232_v17 = vld [vmem:[%s2966_s1 + $0xe0] sm:$0xff]   ;;  %v2236_v21 = vld [vmem:[%s2966_s1 + $0xe8] sm:$0xff]  }
   0x7   :  { %v2229_v14 = vld [vmem:[%s2966_s1 + $0x18] sm:$0xff]   ;;  %v2233_v18 = vld [vmem:[%s2966_s1 + $0x20] sm:$0xff]   ;;  %v2237_v22 = vld [vmem:[%s2966_s1 + $0x28] sm:$0xff]  }
   0x8   :  { %1898 = vmatpush3.bf16.msra.mxu0 %v2221_v6  ;;  %v2230_v15 = vld [vmem:[%s2966_s1 + $0x98] sm:$0xff]   ;;  %v2234_v19 = vld [vmem:[%s2966_s1 + $0xa0] sm:$0xff]   ;;  %v2238_v23 = vld [vmem:[%s2966_s1 + $0xa8] sm:$0xff]  }
   0x9   :  { %1962 = vmatpush3.bf16.msra.mxu1 %v2222_v7  ;;  %1899 = vmatprep.subr.bf16.mxu0 %v2223_v8  ;;  %v2239_v24 = vld [vmem:[%s2966_s1 + $0x70] sm:$0xff]   ;;  %v2243_v28 = vld [vmem:[%s2966_s1 + $0x78] sm:$0xff]   ;;  %v2247_v32 = vld [vmem:[%s2967_s0] ss:$36 sps:$4 sm:$0xff]  }
   0xa   :  { %1963 = vmatprep.subr.bf16.mxu1 %v2224_v9  ;;  %v2240_v25 = vld [vmem:[%s2966_s1 + $0xf0] sm:$0xff]   ;;  %v2244_v29 = vld [vmem:[%s2966_s1 + $0xf8] sm:$0xff]   ;;  %v2249_v33 = vld [vmem:[%s2967_s0 + $0x4] ss:$36 sps:$4 sm:$0xff]  }
   0xb   :  { %v2241_v26 = vld [vmem:[%s2966_s1 + $0x30] sm:$0xff]   ;;  %v2245_v30 = vld [vmem:[%s2966_s1 + $0x38] sm:$0xff]   ;;  %v2250_v34 = vld [vmem:[%s2967_s0 + $0x8] ss:$36 sps:$4 sm:$0xff]   ;;  %1070 = vmatprep.mubr.bf16.mxu0 %v2249_v33 }
   0xc   :  { %1900 = vmatpush3.bf16.msra.mxu0 %v2225_v10  ;;  %v2242_v27 = vld [vmem:[%s2966_s1 + $0xb0] sm:$0xff]   ;;  %v2246_v31 = vld [vmem:[%s2966_s1 + $0xb8] sm:$0xff]   ;;  %v2253_v36 = vld [vmem:[%s2966_s1 + $0x140] sm:$0xff]  }
   0xd   :  { %1964 = vmatpush3.bf16.msra.mxu1 %v2226_v11  ;;  %1901 = vmatprep.subr.bf16.mxu0 %v2227_v12  ;;  %v2252_v35 = vld [vmem:[%s2967_s0 + $0xc] ss:$36 sps:$4 sm:$0xff]   ;;  %v2254_v37 = vld [vmem:[%s2966_s1 + $0x100] sm:$0xff]   ;;  %v2257_v39 = vld [vmem:[%s2967_s0 + $0x54] ss:$36 sps:$4 sm:$0xff]  }
   0xe   :  { %1965 = vmatprep.subr.bf16.mxu1 %v2228_v13  ;;  %1167 = vmatprep.mubr.bf16.mxu1 %v2252_v35  ;;  %v2255_v38 = vld [vmem:[%s2967_s0 + $0x4c] ss:$36 sps:$4 sm:$0xff]   ;;  %v2263_v44 = vld [vmem:[%s2967_s0 + $0x94] ss:$36 sps:$4 sm:$0xff]   ;;  %v2265_v45 = vld [vmem:[%s2967_s0 + $0x9c] ss:$36 sps:$4 sm:$0xff]  }
   0xf   :  { %v2259_v40 = vld [vmem:[%s2967_s0 + $0x48] ss:$36 sps:$4 sm:$0xff]   ;;  %v2260_v41 = vld [vmem:[%s2967_s0 + $0x50] ss:$36 sps:$4 sm:$0xff]   ;;  %v2270_v47 = vld [vmem:[%s2966_s1 + $0x1c0] sm:$0xff]  }
  0x10   :  { %1902 = vmatpush3.bf16.msra.mxu0 %v2229_v14  ;;  %v2261_v42 = vld [vmem:[%s2966_s1 + $0x148] sm:$0xff]   ;;  %v2269_v46 = vld [vmem:[%s2966_s1 + $0x150] sm:$0xff]   ;;  %v2272_v50 = vld [vmem:[%s2966_s1 + $0x180] sm:$0xff]  }
  0x11   :  { %1966 = vmatpush3.bf16.msra.mxu1 %v2230_v15  ;;  %1903 = vmatprep.subr.bf16.mxu0 %v2231_v16  ;;  %v2262_v43 = vld [vmem:[%s2966_s1 + $0x108] sm:$0xff]   ;;  %v2267_v48 = vld [vmem:[%s2967_s0 + $0x90] ss:$36 sps:$4 sm:$0xff]   ;;  %v2268_v51 = vld [vmem:[%s2967_s0 + $0x98] ss:$36 sps:$4 sm:$0xff]  }
  0x12   :  { %1967 = vmatprep.subr.bf16.mxu1 %v2232_v17  ;;  %v2271_v49 = vld [vmem:[%s2966_s1 + $0x110] sm:$0xff]   ;;  %v2273_v52 = vld [vmem:[%s2967_s0 + $0xdc] ss:$36 sps:$4 sm:$0xff]   ;;  %v2275_v53 = vld [vmem:[%s2967_s0 + $0xe4] ss:$36 sps:$4 sm:$0xff]  }
  0x13   :  { %v2279_v54 = vld [vmem:[%s2966_s1 + $0x158] sm:$0xff]   ;;  %v2280_v55 = vld [vmem:[%s2966_s1 + $0x1c8] sm:$0xff]   ;;  %v2278_v59 = vld [vmem:[%s2967_s0 + $0xe0] ss:$36 sps:$4 sm:$0xff]  }
  0x14   :  { %1904 = vmatpush3.bf16.msra.mxu0 %v2233_v18  ;;  %v2281_v56 = vld [vmem:[%s2966_s1 + $0x118] sm:$0xff]   ;;  %v2282_v57 = vld [vmem:[%s2966_s1 + $0x188] sm:$0xff]   ;;  %v2289_v62 = vld [vmem:[%s2966_s1 + $0x160] sm:$0xff]  }
  0x15   :  { %1968 = vmatpush3.bf16.msra.mxu1 %v2234_v19  ;;  %1905 = vmatprep.subr.bf16.mxu0 %v2235_v20  ;;  %v2277_v58 = vld [vmem:[%s2967_s0 + $0xd8] ss:$36 sps:$4 sm:$0xff]   ;;  %v2283_v60 = vld [vmem:[%s2967_s0 + $0x124] ss:$36 sps:$4 sm:$0xff]   ;;  %v2285_v61 = vld [vmem:[%s2967_s0 + $0x12c] ss:$36 sps:$4 sm:$0xff]  }
  0x16   :  { %1969 = vmatprep.subr.bf16.mxu1 %v2236_v21  ;;  %v2290_v63 = vld [vmem:[%s2966_s1 + $0x1d0] sm:$0xff]   ;;  %v2291_v0 = vld [vmem:[%s2966_s1 + $0x120] sm:$0xff]   ;;  %v2288_v3 = vld [vmem:[%s2967_s0 + $0x128] ss:$36 sps:$4 sm:$0xff]  }
  0x17   :  { %v2292_v1 = vld [vmem:[%s2966_s1 + $0x190] sm:$0xff]   ;;  %v2287_v2 = vld [vmem:[%s2967_s0 + $0x120] ss:$36 sps:$4 sm:$0xff]   ;;  %v2299_v6 = vld [vmem:[%s2966_s1 + $0x168] sm:$0xff]  }
  0x18   :  { %1906 = vmatpush3.bf16.msra.mxu0 %v2237_v22  ;;  %v2293_v4 = vld [vmem:[%s2967_s0 + $0x16c] ss:$36 sps:$4 sm:$0xff]   ;;  %v2295_v5 = vld [vmem:[%s2967_s0 + $0x174] ss:$36 sps:$4 sm:$0xff]   ;;  %v2305_v14 = vld [vmem:[%s2967_s0 + $0x1bc] ss:$36 sps:$4 sm:$0xff]  }
  0x19   :  { %1970 = vmatpush3.bf16.msra.mxu1 %v2238_v23  ;;  %1907 = vmatprep.subr.bf16.mxu0 %v2239_v24  ;;  %v2300_v7 = vld [vmem:[%s2966_s1 + $0x1d8] sm:$0xff]   ;;  %v2301_v8 = vld [vmem:[%s2966_s1 + $0x128] sm:$0xff]   ;;  %v2298_v11 = vld [vmem:[%s2967_s0 + $0x170] ss:$36 sps:$4 sm:$0xff]  }
  0x1a   :  { %1971 = vmatprep.subr.bf16.mxu1 %v2240_v25  ;;  %v2302_v9 = vld [vmem:[%s2966_s1 + $0x198] sm:$0xff]   ;;  %v2297_v10 = vld [vmem:[%s2967_s0 + $0x168] ss:$36 sps:$4 sm:$0xff]   ;;  %v2309_v13 = vld [vmem:[%s2966_s1 + $0x170] sm:$0xff]  }
  0x1b   :  { %v2303_v12 = vld [vmem:[%s2967_s0 + $0x1b4] ss:$36 sps:$4 sm:$0xff]   ;;  %v2310_v15 = vld [vmem:[%s2966_s1 + $0x1e0] sm:$0xff]   ;;  %v2313_v18 = vld [vmem:[%s2966_s1 + $0x1e8] sm:$0xff]  }
  0x1c   :  { %1908 = vmatpush3.bf16.msra.mxu0 %v2241_v26  ;;  %v2311_v16 = vld [vmem:[%s2966_s1 + $0x130] sm:$0xff]   ;;  %v2312_v17 = vld [vmem:[%s2966_s1 + $0x1a0] sm:$0xff]   ;;  %v2314_v19 = vld [vmem:[%s2966_s1 + $0x1a8] sm:$0xff]  }
  0x1d   :  { %1972 = vmatpush3.bf16.msra.mxu1 %v2242_v27  ;;  %1909 = vmatprep.subr.bf16.mxu0 %v2243_v28  ;;  %v2307_v20 = vld [vmem:[%s2967_s0 + $0x1b0] ss:$36 sps:$4 sm:$0xff]   ;;  %v2308_v21 = vld [vmem:[%s2967_s0 + $0x1b8] ss:$36 sps:$4 sm:$0xff]   ;;  %v2317_v23 = vld [vmem:[%s2967_s0 + $0x204] ss:$36 sps:$4 sm:$0xff]  }
  0x1e   :  { %1973 = vmatprep.subr.bf16.mxu1 %v2244_v29  ;;  %v2315_v22 = vld [vmem:[%s2967_s0 + $0x1fc] ss:$36 sps:$4 sm:$0xff]   ;;  %v2322_v25 = vld [vmem:[%s2966_s1 + $0x1f0] sm:$0xff]  }
  0x1f   :  { %v2321_v24 = vld [vmem:[%s2966_s1 + $0x178] sm:$0xff]   ;;  %v2324_v27 = vld [vmem:[%s2966_s1 + $0x1b0] sm:$0xff]  }
  0x20   :  { %1910 = vmatpush3.bf16.msra.mxu0 %v2245_v30  ;;  %v2323_v26 = vld [vmem:[%s2966_s1 + $0x138] sm:$0xff]   ;;  %v2320_v30 = vld [vmem:[%s2967_s0 + $0x200] ss:$36 sps:$4 sm:$0xff]   ;;  %v2327_v35 = vld [vmem:[%s2967_s0 + $0x10] ss:$36 sps:$4 sm:$0xff]  }
  0x21   :  { %1974 = vmatpush3.bf16.msra.mxu1 %v2246_v31  ;;  %2023 = vmatprep.subr.bf16.mxu0 %v2253_v36  ;;  %v2325_v28 = vld [vmem:[%s2966_s1 + $0x1f8] sm:$0xff]  }
  0x22   :  { %2087 = vmatprep.subr.bf16.mxu1 %v2270_v47  ;;  %v2319_v29 = vld [vmem:[%s2967_s0 + $0x1f8] ss:$36 sps:$4 sm:$0xff]   ;;  %v2345_v47 = vld [vmem:[%s2967_s0 + $0xa0] ss:$36 sps:$4 sm:$0xff]  }
  0x23   :  { %1071 = vmatmul.mubr.bf16.vlgmr.msra.gmra.mrb[0].mxu0 %v2247_v32  ;;  %v2326_v31 = vld [vmem:[%s2966_s1 + $0x1b8] sm:$0xff]   ;;  %v2333_v32 = vld [vmem:[%s2966_s1 + $0x200] sm:$0xff]  }
  0x24   :  { %1168 = vmatmul.mubr.bf16.vlgmr.msra.gmra.mrb[0].mxu1 %v2250_v34  ;;  %2024 = vmatpush3.bf16.msra.mxu0 %v2254_v37  ;;  %v2329_v33 = vld [vmem:[%s2967_s0 + $0x14] ss:$36 sps:$4 sm:$0xff]   ;;  %v2332_v34 = vld [vmem:[%s2967_s0 + $0x1c] ss:$36 sps:$4 sm:$0xff]  }
  0x25   :  { %1078 = vmatprep.mubr.bf16.mxu0 %v2255_v38  ;;  %1175 = vmatprep.mubr.bf16.mxu1 %v2257_v39  ;;  %v2330_v36 = vld [vmem:[%s2967_s0 + $0x18] ss:$36 sps:$4 sm:$0xff]   ;;  %v2336_v38 = vld [vmem:[%s2967_s0 + $0x64] ss:$36 sps:$4 sm:$0xff]  }
  0x26   :  { %2025 = vmatprep.subr.bf16.mxu0 %v2261_v42  ;;  %2088 = vmatpush3.bf16.msra.mxu1 %v2272_v50  ;;  %v2334_v37 = vld [vmem:[%s2967_s0 + $0x5c] ss:$36 sps:$4 sm:$0xff]   ;;  %v2340_v39 = vld [vmem:[%s2966_s1 + $0x208] sm:$0xff]   ;;  %v2350_v50 = vld [vmem:[%s2967_s0 + $0xf4] ss:$36 sps:$4 sm:$0xff]  }
  0x27   :  { %2089 = vmatprep.subr.bf16.mxu1 %v2280_v55  ;;  %v2339_v42 = vld [vmem:[%s2967_s0 + $0x60] ss:$36 sps:$4 sm:$0xff]   ;;  %v2355_v55 = vld [vmem:[%s2967_s0 + $0x134] ss:$36 sps:$4 sm:$0xff]  }
  0x28   :  { %2026 = vmatpush3.bf16.msra.mxu0 %v2262_v43  ;;  %v2341_v43 = vld [vmem:[%s2967_s0 + $0xa4] ss:$36 sps:$4 sm:$0xff]  }
  0x29   :  { %2027 = vmatprep.subr.bf16.mxu0 %v2269_v46  ;;  %v2361_v46 = vld [vmem:[%s2966_s1 + $0x220] sm:$0xff]  }
  0x2a   :  { %2090 = vmatpush3.bf16.msra.mxu1 %v2282_v57  ;;  %v2382_v57 = vld [vmem:[%s2966_s1 + $0x238] sm:$0xff]  }
  0x2b   :  { %1079 = vmatmul.mubr.bf16.gmra.mrb[4].mxu0 %v2259_v40  ;;  %2091 = vmatprep.subr.bf16.mxu1 %v2290_v63  ;;  %v2347_v40 = vld [vmem:[%s2966_s1 + $0x210] sm:$0xff]   ;;  %v2367_v63 = vld [vmem:[%s2967_s0 + $0x180] ss:$36 sps:$4 sm:$0xff]  }
  0x2c   :  { %1176 = vmatmul.mubr.bf16.gmra.mrb[4].mxu1 %v2260_v41  ;;  %1086 = vmatprep.mubr.bf16.mxu0 %v2263_v44  ;;  %v2338_v41 = vld [vmem:[%s2967_s0 + $0x58] ss:$36 sps:$4 sm:$0xff]   ;;  %v2343_v44 = vld [vmem:[%s2967_s0 + $0xac] ss:$36 sps:$4 sm:$0xff]  }
  0x2d   :  { %1183 = vmatprep.mubr.bf16.mxu1 %v2265_v45  ;;  %2028 = vmatpush3.bf16.msra.mxu0 %v2271_v49  ;;  %v2354_v45 = vld [vmem:[%s2966_s1 + $0x218] sm:$0xff]   ;;  %v2348_v49 = vld [vmem:[%s2967_s0 + $0xec] ss:$36 sps:$4 sm:$0xff]  }
  0x2e   :  { %2029 = vmatprep.subr.bf16.mxu0 %v2279_v54  ;;  %2092 = vmatpush3.bf16.msra.mxu1 %v2292_v1  ;;  %v2353_v54 = vld [vmem:[%s2967_s0 + $0xf0] ss:$36 sps:$4 sm:$0xff]  }
  0x2f   :  { %2093 = vmatprep.subr.bf16.mxu1 %v2300_v7  ;;  %v2371_v1 = vld [vmem:[%s2967_s0 + $0x1cc] ss:$36 sps:$4 sm:$0xff]  }
  0x30   :  { %v2381_v7 = vld [vmem:[%s2967_s0 + $0x210] ss:$36 sps:$4 sm:$0xff]  }
  0x31   :  { %2030 = vmatpush3.bf16.msra.mxu0 %v2281_v56  ;;  %v2357_v56 = vld [vmem:[%s2967_s0 + $0x13c] ss:$36 sps:$4 sm:$0xff]  }
  0x32   :  { %2031 = vmatprep.subr.bf16.mxu0 %v2289_v62  ;;  %2094 = vmatpush3.bf16.msra.mxu1 %v2302_v9  ;;  %v2366_v62 = vld [vmem:[%s2967_s0 + $0x178] ss:$36 sps:$4 sm:$0xff]   ;;  %v2384_v9 = vld [vmem:[%s2967_s0 + $0x140] ss:$36 sps:$4 sm:$0xff]  }
  0x33   :  { %1087 = vmatmul.mubr.bf16.gmra.mrb[8].mxu0 %v2267_v48  ;;  %2095 = vmatprep.subr.bf16.mxu1 %v2310_v15  ;;  %v2346_v48 = vld [vmem:[%s2967_s0 + $0xa8] ss:$36 sps:$4 sm:$0xff]   ;;  %v2390_v15 = vld [vmem:[%s2967_s0 + $0x218] ss:$36 sps:$4 sm:$0xff]  }
  0x34   :  { %1184 = vmatmul.mubr.bf16.gmra.mrb[8].mxu1 %v2268_v51  ;;  %1094 = vmatprep.mubr.bf16.mxu0 %v2273_v52  ;;  %v2368_v51 = vld [vmem:[%s2966_s1 + $0x228] sm:$0xff]  }
  0x35   :  { %1191 = vmatprep.mubr.bf16.mxu1 %v2275_v53  ;;  %2032 = vmatpush3.bf16.msra.mxu0 %v2291_v0  ;;  %v2352_v52 = vld [vmem:[%s2967_s0 + $0xe8] ss:$36 sps:$4 sm:$0xff]   ;;  %v2375_v53 = vld [vmem:[%s2966_s1 + $0x230] sm:$0xff]  }
  0x36   :  { %2033 = vmatprep.subr.bf16.mxu0 %v2299_v6  ;;  %2096 = vmatpush3.bf16.msra.mxu1 %v2312_v17  ;;  %v2369_v0 = vld [vmem:[%s2967_s0 + $0x1c4] ss:$36 sps:$4 sm:$0xff]  }
  0x37   :  { %2097 = vmatprep.subr.bf16.mxu1 %v2313_v18  ;;  %v2380_v6 = vld [vmem:[%s2967_s0 + $0x208] ss:$36 sps:$4 sm:$0xff]  }
  0x39   :  { %2034 = vmatpush3.bf16.msra.mxu0 %v2301_v8  ;;  %v2383_v8 = vld [vmem:[%s2967_s0 + $0x20] ss:$36 sps:$4 sm:$0xff]  }
  0x3a   :  { %2035 = vmatprep.subr.bf16.mxu0 %v2309_v13  ;;  %2098 = vmatpush3.bf16.msra.mxu1 %v2314_v19  ;;  %v2388_v13 = vld [vmem:[%s2967_s0 + $0x1d0] ss:$36 sps:$4 sm:$0xff]  }
  0x3b   :  { %1095 = vmatmul.mubr.bf16.gmra.mrb[12].mxu0 %v2277_v58  ;;  %2099 = vmatprep.subr.bf16.mxu1 %v2322_v25  ;;  %v2359_v58 = vld [vmem:[%s2967_s0 + $0x130] ss:$36 sps:$4 sm:$0xff]  }
  0x3c   :  { %1192 = vmatmul.mubr.bf16.gmra.mrb[12].mxu1 %v2278_v59  ;;  %1102 = vmatprep.mubr.bf16.mxu0 %v2283_v60  ;;  %v2360_v59 = vld [vmem:[%s2967_s0 + $0x138] ss:$36 sps:$4 sm:$0xff]  }
  0x3d   :  { %1199 = vmatprep.mubr.bf16.mxu1 %v2285_v61  ;;  %2036 = vmatpush3.bf16.msra.mxu0 %v2311_v16  ;;  %v2362_v60 = vld [vmem:[%s2967_s0 + $0x17c] ss:$36 sps:$4 sm:$0xff]   ;;  %v2364_v61 = vld [vmem:[%s2967_s0 + $0x184] ss:$36 sps:$4 sm:$0xff]  }
  0x3e   :  { %2037 = vmatprep.subr.bf16.mxu0 %v2321_v24  ;;  %2100 = vmatpush3.bf16.msra.mxu1 %v2324_v27 }
  0x3f   :  { %2101 = vmatprep.subr.bf16.mxu1 %v2325_v28 }
  0x41   :  { %2038 = vmatpush3.bf16.msra.mxu0 %v2323_v26 }
  0x42   :  { %2167 = vmatprep.subr.bf16.mxu0 %v2333_v32  ;;  %2102 = vmatpush3.bf16.msra.mxu1 %v2326_v31 }
  0x43   :  { %1103 = vmatmul.mubr.bf16.gmra.mrb[16].mxu0 %v2287_v2  ;;  %2199 = vmatprep.subr.bf16.mxu1 %v2333_v32  ;;  %v2373_v2 = vld [vmem:[%s2967_s0 + $0x1c0] ss:$36 sps:$4 sm:$0xff]  }
  0x44   :  { %1200 = vmatmul.mubr.bf16.gmra.mrb[16].mxu1 %v2288_v3  ;;  %1110 = vmatprep.mubr.bf16.mxu0 %v2293_v4  ;;  %v2374_v3 = vld [vmem:[%s2967_s0 + $0x1c8] ss:$36 sps:$4 sm:$0xff]  }
  0x45   :  { %1207 = vmatprep.mubr.bf16.mxu1 %v2295_v5  ;;  %v2376_v4 = vld [vmem:[%s2967_s0 + $0x20c] ss:$36 sps:$4 sm:$0xff]   ;;  %v2378_v5 = vld [vmem:[%s2967_s0 + $0x214] ss:$36 sps:$4 sm:$0xff]  }
  0x4b   :  { %1111 = vmatmul.mubr.bf16.gmra.mrb[20].mxu0 %v2297_v10  ;;  %v2385_v10 = vld [vmem:[%s2967_s0 + $0x68] ss:$36 sps:$4 sm:$0xff]  }
  0x4c   :  { %1208 = vmatmul.mubr.bf16.gmra.mrb[20].mxu1 %v2298_v11  ;;  %1118 = vmatprep.mubr.bf16.mxu0 %v2303_v12  ;;  %v2386_v11 = vld [vmem:[%s2967_s0 + $0x188] ss:$36 sps:$4 sm:$0xff]   ;;  %v2387_v12 = vld [vmem:[%s2967_s0 + $0xb0] ss:$36 sps:$4 sm:$0xff]  }
  0x4d   :  { %1215 = vmatprep.mubr.bf16.mxu1 %v2305_v14  ;;  %v2389_v14 = vld [vmem:[%s2967_s0 + $0xf8] ss:$36 sps:$4 sm:$0xff]  }
  0x53   :  { %1119 = vmatmul.mubr.bf16.gmra.mrb[24].mxu0 %v2307_v20 }
  0x54   :  { %1216 = vmatmul.mubr.bf16.gmra.mrb[24].mxu1 %v2308_v21  ;;  %1126 = vmatprep.mubr.bf16.mxu0 %v2315_v22 }
  0x55   :  { %1223 = vmatprep.mubr.bf16.mxu1 %v2317_v23 }
  0x5b   :  { %1127 = vmatmul.mubr.bf16.gmra.mrb[28].mxu0 %v2319_v29 }
  0x5c   :  { %1224 = vmatmul.mubr.bf16.gmra.mrb[28].mxu1 %v2320_v30  ;;  %1264 = vmatprep.mubr.bf16.mxu0 %v2329_v33 }
  0x5d   :  { %1361 = vmatprep.mubr.bf16.mxu1 %v2332_v34 }
  0x63   :  { %1265 = vmatmul.mubr.bf16.vlgmr.msra.gmra.mrb[32].mxu0 %v2327_v35 }
  0x64   :  { %1362 = vmatmul.mubr.bf16.vlgmr.msra.gmra.mrb[32].mxu1 %v2330_v36  ;;  %2168 = vmatpush3.bf16.msra.mxu0 %v2333_v32 }
  0x65   :  { %1272 = vmatprep.mubr.bf16.mxu0 %v2334_v37  ;;  %1369 = vmatprep.mubr.bf16.mxu1 %v2336_v38 }
  0x66   :  { %2169 = vmatprep.subr.bf16.mxu0 %v2340_v39  ;;  %2207 = vmatpush3.bf16.msra.mxu1 %v2333_v32 }
  0x67   :  { %2200 = vmatprep.subr.bf16.mxu1 %v2340_v39 }
  0x68   :  { %2170 = vmatpush3.bf16.msra.mxu0 %v2340_v39 }
  0x69   :  { %2171 = vmatprep.subr.bf16.mxu0 %v2347_v40 }
  0x6a   :  { %2208 = vmatpush3.bf16.msra.mxu1 %v2340_v39 }
  0x6b   :  { %1273 = vmatmul.mubr.bf16.gmra.mrb[36].mxu0 %v2338_v41  ;;  %2201 = vmatprep.subr.bf16.mxu1 %v2347_v40 }
  0x6c   :  { %1370 = vmatmul.mubr.bf16.gmra.mrb[36].mxu1 %v2339_v42  ;;  %1280 = vmatprep.mubr.bf16.mxu0 %v2341_v43 }
  0x6d   :  { %1377 = vmatprep.mubr.bf16.mxu1 %v2343_v44  ;;  %2172 = vmatpush3.bf16.msra.mxu0 %v2347_v40 }
  0x6e   :  { %2173 = vmatprep.subr.bf16.mxu0 %v2354_v45  ;;  %2209 = vmatpush3.bf16.msra.mxu1 %v2347_v40 }
  0x6f   :  { %2202 = vmatprep.subr.bf16.mxu1 %v2354_v45 }
  0x71   :  { %2174 = vmatpush3.bf16.msra.mxu0 %v2354_v45 }
  0x72   :  { %2175 = vmatprep.subr.bf16.mxu0 %v2361_v46  ;;  %2210 = vmatpush3.bf16.msra.mxu1 %v2354_v45 }
  0x73   :  { %1281 = vmatmul.mubr.bf16.gmra.mrb[40].mxu0 %v2345_v47  ;;  %2203 = vmatprep.subr.bf16.mxu1 %v2361_v46 }
  0x74   :  { %1378 = vmatmul.mubr.bf16.gmra.mrb[40].mxu1 %v2346_v48  ;;  %1288 = vmatprep.mubr.bf16.mxu0 %v2348_v49 }
  0x75   :  { %1385 = vmatprep.mubr.bf16.mxu1 %v2350_v50  ;;  %2176 = vmatpush3.bf16.msra.mxu0 %v2361_v46 }
  0x76   :  { %2177 = vmatprep.subr.bf16.mxu0 %v2368_v51  ;;  %2211 = vmatpush3.bf16.msra.mxu1 %v2361_v46 }
  0x77   :  { %2204 = vmatprep.subr.bf16.mxu1 %v2368_v51 }
  0x79   :  { %2178 = vmatpush3.bf16.msra.mxu0 %v2368_v51 }
  0x7a   :  { %2179 = vmatprep.subr.bf16.mxu0 %v2375_v53  ;;  %2212 = vmatpush3.bf16.msra.mxu1 %v2368_v51 }
  0x7b   :  { %1289 = vmatmul.mubr.bf16.gmra.mrb[44].mxu0 %v2352_v52  ;;  %2205 = vmatprep.subr.bf16.mxu1 %v2375_v53 }
  0x7c   :  { %1386 = vmatmul.mubr.bf16.gmra.mrb[44].mxu1 %v2353_v54  ;;  %1296 = vmatprep.mubr.bf16.mxu0 %v2355_v55 }
  0x7d   :  { %1393 = vmatprep.mubr.bf16.mxu1 %v2357_v56  ;;  %2180 = vmatpush3.bf16.msra.mxu0 %v2375_v53 }
  0x7e   :  { %2181 = vmatprep.subr.bf16.mxu0 %v2382_v57  ;;  %2213 = vmatpush3.bf16.msra.mxu1 %v2375_v53 }
  0x7f   :  { %2206 = vmatprep.subr.bf16.mxu1 %v2382_v57 }
  0x81   :  { %2182 = vmatpush3.bf16.msra.mxu0 %v2382_v57 }
  0x82   :  { %2214 = vmatpush3.bf16.msra.mxu1 %v2382_v57 }
  0x83   :  { %1297 = vmatmul.mubr.bf16.gmra.mrb[48].mxu0 %v2359_v58 }
  0x84   :  { %1394 = vmatmul.mubr.bf16.gmra.mrb[48].mxu1 %v2360_v59  ;;  %1304 = vmatprep.mubr.bf16.mxu0 %v2362_v60 }
  0x85   :  { %1401 = vmatprep.mubr.bf16.mxu1 %v2364_v61 }
  0x8b   :  { %1305 = vmatmul.mubr.bf16.gmra.mrb[52].mxu0 %v2366_v62 }
  0x8c   :  { %1402 = vmatmul.mubr.bf16.gmra.mrb[52].mxu1 %v2367_v63  ;;  %1312 = vmatprep.mubr.bf16.mxu0 %v2369_v0 }
  0x8d   :  { %1409 = vmatprep.mubr.bf16.mxu1 %v2371_v1 }
  0x93   :  { %1313 = vmatmul.mubr.bf16.gmra.mrb[56].mxu0 %v2373_v2 }
  0x94   :  { %1410 = vmatmul.mubr.bf16.gmra.mrb[56].mxu1 %v2374_v3  ;;  %1320 = vmatprep.mubr.bf16.mxu0 %v2376_v4 }
  0x95   :  { %1417 = vmatprep.mubr.bf16.mxu1 %v2378_v5 }
  0x9b   :  { %1321 = vmatmul.mubr.bf16.gmra.mrb[60].mxu0 %v2380_v6 }
  0x9c   :  { %1418 = vmatmul.mubr.bf16.gmra.mrb[60].mxu1 %v2381_v7  ;;  %2183 = vmatprep.mubr.bf16.mxu0 %v2383_v8 }
  0x9d   :  { %2191 = vmatprep.mubr.bf16.mxu1 %v2384_v9 }
  0xa3   :  { %2184 = vmatmul.mubr.bf16.vlgmr.msra.gmra.mrb[64].mxu0 %v2385_v10 }
  0xa4   :  { %2192 = vmatmul.mubr.bf16.vlgmr.msra.gmra.mrb[64].mxu1 %v2386_v11  ;;  %2187 = vmatprep.mubr.bf16.mxu0 %v2387_v12 }
  0xa5   :  { %2195 = vmatprep.mubr.bf16.mxu1 %v2388_v13 }
  0xab   :  { %2188 = vmatmul.mubr.bf16.gmra.mrb[68].mxu0 %v2389_v14 }
  0xac   :  { %2196 = vmatmul.mubr.bf16.gmra.mrb[68].mxu1 %v2390_v15 }
  0xf6   :  { %v1911_v16 = vpop.f32.mrb[0].mxu0 }
  0xf7   :  { %v1975_v17 = vpop.f32.mrb[0].mxu1  ;;  %v1912_v18 = vpop.f32.mrb[1].mxu0 }
  0xf8   :  { %v1913_v19 = vadd.f32 %v1912_v18, %v1911_v16  ;;  %v1976_v20 = vpop.f32.mrb[1].mxu1  ;;  %v1914_v21 = vpop.f32.mrb[2].mxu0 }
  0xf9   :  { %v1977_v22 = vadd.f32 %v1976_v20, %v1975_v17  ;;  %v1978_v23 = vpop.f32.mrb[2].mxu1  ;;  %v1915_v24 = vpop.f32.mrb[3].mxu0 }
  0xfa   :  { %v1916_v25 = vadd.f32 %v1915_v24, %v1914_v21  ;;  %v1979_v26 = vpop.f32.mrb[3].mxu1 }
  0xfb   :  { %v2843_v27 = vadd.f32 %v1977_v22, %v1913_v19  ;;  %v1980_v28 = vadd.f32 %v1979_v26, %v1978_v23 }
  0xfd   :  { %v2845_v29 = vadd.f32 %v1980_v28, %v1916_v25 }
  0xfe   :  { %v1917_v30 = vpop.f32.mrb[4].mxu0 }
  0xff   :  { %v1981_v31 = vpop.f32.mrb[4].mxu1  ;;  %v1918_v32 = vpop.f32.mrb[5].mxu0 }
 0x100   :  { %v1919_v33 = vadd.f32 %v1918_v32, %v1917_v30  ;;  %v1982_v34 = vpop.f32.mrb[5].mxu1  ;;  %v1920_v35 = vpop.f32.mrb[6].mxu0 }
 0x101   :  { %v1983_v36 = vadd.f32 %v1982_v34, %v1981_v31  ;;  %v1984_v37 = vpop.f32.mrb[6].mxu1  ;;  %v1921_v38 = vpop.f32.mrb[7].mxu0 }
 0x102   :  { %v1922_v39 = vadd.f32 %v1921_v38, %v1920_v35  ;;  %v1985_v40 = vpop.f32.mrb[7].mxu1 }
 0x103   :  { %v2847_v41 = vadd.f32 %v1983_v36, %v1919_v33  ;;  %v1986_v42 = vadd.f32 %v1985_v40, %v1984_v37 }
 0x105   :  { %v2849_v43 = vadd.f32 %v1986_v42, %v1922_v39 }
 0x106   :  { %v1923_v44 = vpop.f32.mrb[8].mxu0 }
 0x107   :  { %v1987_v45 = vpop.f32.mrb[8].mxu1  ;;  %v1924_v46 = vpop.f32.mrb[9].mxu0 }
 0x108   :  { %v1925_v47 = vadd.f32 %v1924_v46, %v1923_v44  ;;  %v1988_v48 = vpop.f32.mrb[9].mxu1  ;;  %v1926_v49 = vpop.f32.mrb[10].mxu0 }
 0x109   :  { %v1989_v50 = vadd.f32 %v1988_v48, %v1987_v45  ;;  %v1990_v51 = vpop.f32.mrb[10].mxu1  ;;  %v1927_v52 = vpop.f32.mrb[11].mxu0 }
 0x10a   :  { %v1928_v53 = vadd.f32 %v1927_v52, %v1926_v49  ;;  %v1991_v54 = vpop.f32.mrb[11].mxu1 }
 0x10b   :  { %v2851_v55 = vadd.f32 %v1989_v50, %v1925_v47  ;;  %v1992_v56 = vadd.f32 %v1991_v54, %v1990_v51 }
 0x10d   :  { %v2853_v57 = vadd.f32 %v1992_v56, %v1928_v53 }
 0x10e   :  { %v1929_v58 = vpop.f32.mrb[12].mxu0 }
 0x10f   :  { %v1993_v59 = vpop.f32.mrb[12].mxu1  ;;  %v1930_v60 = vpop.f32.mrb[13].mxu0 }
 0x110   :  { %v1931_v61 = vadd.f32 %v1930_v60, %v1929_v58  ;;  %v1994_v62 = vpop.f32.mrb[13].mxu1  ;;  %v1932_v63 = vpop.f32.mrb[14].mxu0 }
 0x111   :  { %v1995_v0 = vadd.f32 %v1994_v62, %v1993_v59  ;;  %v1996_v1 = vpop.f32.mrb[14].mxu1  ;;  %v1933_v2 = vpop.f32.mrb[15].mxu0 }
 0x112   :  { %v1934_v3 = vadd.f32 %v1933_v2, %v1932_v63  ;;  %v1997_v4 = vpop.f32.mrb[15].mxu1 }
 0x113   :  { %v2855_v5 = vadd.f32 %v1995_v0, %v1931_v61  ;;  %v1998_v6 = vadd.f32 %v1997_v4, %v1996_v1 }
 0x115   :  { %v2857_v7 = vadd.f32 %v1998_v6, %v1934_v3 }
 0x116   :  { %v1935_v8 = vpop.f32.mrb[16].mxu0 }
 0x117   :  { %v1999_v9 = vpop.f32.mrb[16].mxu1  ;;  %v1936_v10 = vpop.f32.mrb[17].mxu0 }
 0x118   :  { %v1937_v11 = vadd.f32 %v1936_v10, %v1935_v8  ;;  %v2000_v12 = vpop.f32.mrb[17].mxu1  ;;  %v1938_v13 = vpop.f32.mrb[18].mxu0 }
 0x119   :  { %v2001_v14 = vadd.f32 %v2000_v12, %v1999_v9  ;;  %v2002_v15 = vpop.f32.mrb[18].mxu1  ;;  %v1939_v16 = vpop.f32.mrb[19].mxu0 }
 0x11a   :  { %v1940_v17 = vadd.f32 %v1939_v16, %v1938_v13  ;;  %v2003_v18 = vpop.f32.mrb[19].mxu1 }
 0x11b   :  { %v2859_v19 = vadd.f32 %v2001_v14, %v1937_v11  ;;  %v2004_v20 = vadd.f32 %v2003_v18, %v2002_v15 }
 0x11d   :  { %v2861_v21 = vadd.f32 %v2004_v20, %v1940_v17 }
 0x11e   :  { %v1941_v22 = vpop.f32.mrb[20].mxu0 }
 0x11f   :  { %v2005_v23 = vpop.f32.mrb[20].mxu1  ;;  %v1942_v24 = vpop.f32.mrb[21].mxu0 }
 0x120   :  { %v1943_v25 = vadd.f32 %v1942_v24, %v1941_v22  ;;  %v2006_v26 = vpop.f32.mrb[21].mxu1  ;;  %v1944_v28 = vpop.f32.mrb[22].mxu0 }
 0x121   :  { %v2007_v30 = vadd.f32 %v2006_v26, %v2005_v23  ;;  %v2008_v31 = vpop.f32.mrb[22].mxu1  ;;  %v1945_v32 = vpop.f32.mrb[23].mxu0 }
 0x122   :  { %v1946_v33 = vadd.f32 %v1945_v32, %v1944_v28  ;;  %v2009_v34 = vpop.f32.mrb[23].mxu1 }
 0x123   :  { %v2863_v35 = vadd.f32 %v2007_v30, %v1943_v25  ;;  %v2010_v36 = vadd.f32 %v2009_v34, %v2008_v31 }
 0x125   :  { %v2865_v37 = vadd.f32 %v2010_v36, %v1946_v33 }
 0x126   :  { %v1947_v38 = vpop.f32.mrb[24].mxu0 }
 0x127   :  { %v2011_v39 = vpop.f32.mrb[24].mxu1  ;;  %v1948_v40 = vpop.f32.mrb[25].mxu0 }
 0x128   :  { %v1949_v42 = vadd.f32 %v1948_v40, %v1947_v38  ;;  %v2012_v44 = vpop.f32.mrb[25].mxu1  ;;  %v1950_v45 = vpop.f32.mrb[26].mxu0 }
 0x129   :  { %v2013_v46 = vadd.f32 %v2012_v44, %v2011_v39  ;;  %v2014_v47 = vpop.f32.mrb[26].mxu1  ;;  %v1951_v48 = vpop.f32.mrb[27].mxu0 }
 0x12a   :  { %v1952_v49 = vadd.f32 %v1951_v48, %v1950_v45  ;;  %v2015_v50 = vpop.f32.mrb[27].mxu1 }
 0x12b   :  { %v2867_v51 = vadd.f32 %v2013_v46, %v1949_v42  ;;  %v2016_v52 = vadd.f32 %v2015_v50, %v2014_v47 }
 0x12d   :  { %v2869_v53 = vadd.f32 %v2016_v52, %v1952_v49 }
 0x12e   :  { %v1953_v54 = vpop.f32.mrb[28].mxu0 }
 0x12f   :  { %v2017_v56 = vpop.f32.mrb[28].mxu1  ;;  %v1954_v58 = vpop.f32.mrb[29].mxu0 }
 0x130   :  { %v1955_v59 = vadd.f32 %v1954_v58, %v1953_v54  ;;  %v2018_v60 = vpop.f32.mrb[29].mxu1  ;;  %v1956_v61 = vpop.f32.mrb[30].mxu0 }
 0x131   :  { %v2019_v62 = vadd.f32 %v2018_v60, %v2017_v56  ;;  %v2020_v63 = vpop.f32.mrb[30].mxu1  ;;  %v1957_v0 = vpop.f32.mrb[31].mxu0 }
 0x132   :  { %v1958_v1 = vadd.f32 %v1957_v0, %v1956_v61  ;;  %v2021_v2 = vpop.f32.mrb[31].mxu1 }
 0x133   :  { %v2871_v3 = vadd.f32 %v2019_v62, %v1955_v59  ;;  %v2022_v4 = vadd.f32 %v2021_v2, %v2020_v63 }
 0x135   :  { %v2873_v6 = vadd.f32 %v2022_v4, %v1958_v1 }
 0x136   :  { %v2039_v8 = vpop.f32.mrb[32].mxu0 }
 0x137   :  { %v2040_v9 = vpop.f32.mrb[33].mxu0  ;;  %v2103_v10 = vpop.f32.mrb[32].mxu1 }
 0x138   :  { %v2041_v11 = vadd.f32 %v2040_v9, %v2039_v8  ;;  %v2042_v12 = vpop.f32.mrb[34].mxu0  ;;  %v2104_v13 = vpop.f32.mrb[33].mxu1 }
 0x139   :  { %v2043_v14 = vpop.f32.mrb[35].mxu0  ;;  %v2105_v15 = vadd.f32 %v2104_v13, %v2103_v10  ;;  %v2106_v16 = vpop.f32.mrb[34].mxu1 }
 0x13a   :  { %v1267_v17 = vadd.f32 %v2041_v11, %v2843_v27  ;;  %v2044_v18 = vadd.f32 %v2043_v14, %v2042_v12  ;;  %v2107_v20 = vpop.f32.mrb[35].mxu1 }
 0x13b   :  { %v2108_v22 = vadd.f32 %v2107_v20, %v2106_v16 }
 0x13c   :  { %v1270_v23 = vadd.f32 %v2044_v18, %v2845_v29  ;;  %v2877_v24 = vadd.f32 %v2105_v15, %v1267_v17 }
 0x13e   :  { %v2045_v25 = vpop.f32.mrb[36].mxu0  ;;  %v2879_v26 = vadd.f32 %v2108_v22, %v1270_v23 }
 0x13f   :  { %v2046_v28 = vpop.f32.mrb[37].mxu0  ;;  %v2109_v30 = vpop.f32.mrb[36].mxu1 }
 0x140   :  { %v2047_v31 = vadd.f32 %v2046_v28, %v2045_v25  ;;  %v2048_v32 = vpop.f32.mrb[38].mxu0  ;;  %v2110_v33 = vpop.f32.mrb[37].mxu1 }
 0x141   :  { %v2049_v34 = vpop.f32.mrb[39].mxu0  ;;  %v2111_v36 = vadd.f32 %v2110_v33, %v2109_v30  ;;  %v2112_v38 = vpop.f32.mrb[38].mxu1 }
 0x142   :  { %v1275_v27 = vadd.f32 %v2047_v31, %v2847_v41  ;;  %v2050_v39 = vadd.f32 %v2049_v34, %v2048_v32  ;;  %v2113_v40 = vpop.f32.mrb[39].mxu1 }
 0x143   :  { %v2114_v42 = vadd.f32 %v2113_v40, %v2112_v38 }
 0x144   :  { %v1278_v29 = vadd.f32 %v2050_v39, %v2849_v43  ;;  %v2883_v44 = vadd.f32 %v2111_v36, %v1275_v27 }
 0x146   :  { %v2051_v45 = vpop.f32.mrb[40].mxu0  ;;  %v2885_v46 = vadd.f32 %v2114_v42, %v1278_v29 }
 0x147   :  { %v2052_v47 = vpop.f32.mrb[41].mxu0  ;;  %v2115_v48 = vpop.f32.mrb[40].mxu1 }
 0x148   :  { %v2053_v49 = vadd.f32 %v2052_v47, %v2051_v45  ;;  %v2054_v50 = vpop.f32.mrb[42].mxu0  ;;  %v2116_v52 = vpop.f32.mrb[41].mxu1 }
 0x149   :  { %v2055_v54 = vpop.f32.mrb[43].mxu0  ;;  %v2117_v56 = vadd.f32 %v2116_v52, %v2115_v48  ;;  %v2118_v58 = vpop.f32.mrb[42].mxu1 }
 0x14a   :  { %v1283_v41 = vadd.f32 %v2053_v49, %v2851_v55  ;;  %v2056_v59 = vadd.f32 %v2055_v54, %v2054_v50  ;;  %v2119_v60 = vpop.f32.mrb[43].mxu1 }
 0x14b   :  { %v2120_v61 = vadd.f32 %v2119_v60, %v2118_v58 }
 0x14c   :  { %v1286_v43 = vadd.f32 %v2056_v59, %v2853_v57  ;;  %v2889_v62 = vadd.f32 %v2117_v56, %v1283_v41 }
 0x14e   :  { %v2057_v63 = vpop.f32.mrb[44].mxu0  ;;  %v2891_v0 = vadd.f32 %v2120_v61, %v1286_v43 }
 0x14f   :  { %v2058_v1 = vpop.f32.mrb[45].mxu0  ;;  %v2121_v2 = vpop.f32.mrb[44].mxu1 }
 0x150   :  { %v2059_v4 = vadd.f32 %v2058_v1, %v2057_v63  ;;  %v2060_v8 = vpop.f32.mrb[46].mxu0  ;;  %v2122_v9 = vpop.f32.mrb[45].mxu1 }
 0x151   :  { %v2061_v10 = vpop.f32.mrb[47].mxu0  ;;  %v2123_v11 = vadd.f32 %v2122_v9, %v2121_v2  ;;  %v2124_v12 = vpop.f32.mrb[46].mxu1 }
 0x152   :  { %v1291_v55 = vadd.f32 %v2059_v4, %v2855_v5  ;;  %v2062_v13 = vadd.f32 %v2061_v10, %v2060_v8  ;;  %v2125_v14 = vpop.f32.mrb[47].mxu1 }
 0x153   :  { %v2126_v15 = vadd.f32 %v2125_v14, %v2124_v12 }
 0x154   :  { %v1294_v57 = vadd.f32 %v2062_v13, %v2857_v7  ;;  %v2895_v16 = vadd.f32 %v2123_v11, %v1291_v55 }
 0x156   :  { %v2063_v17 = vpop.f32.mrb[48].mxu0  ;;  %v2897_v18 = vadd.f32 %v2126_v15, %v1294_v57 }
 0x157   :  { %v2064_v20 = vpop.f32.mrb[49].mxu0  ;;  %v2127_v22 = vpop.f32.mrb[48].mxu1 }
 0x158   :  { %v2065_v23 = vadd.f32 %v2064_v20, %v2063_v17  ;;  %v2066_v25 = vpop.f32.mrb[50].mxu0  ;;  %v2128_v28 = vpop.f32.mrb[49].mxu1 }
 0x159   :  { %v2067_v30 = vpop.f32.mrb[51].mxu0  ;;  %v2129_v31 = vadd.f32 %v2128_v28, %v2127_v22  ;;  %v2130_v32 = vpop.f32.mrb[50].mxu1 }
 0x15a   :  { %v1299_v5 = vadd.f32 %v2065_v23, %v2859_v19  ;;  %v2068_v33 = vadd.f32 %v2067_v30, %v2066_v25  ;;  %v2131_v34 = vpop.f32.mrb[51].mxu1 }
 0x15b   :  { %v2132_v36 = vadd.f32 %v2131_v34, %v2130_v32 }
 0x15c   :  { %v1302_v7 = vadd.f32 %v2068_v33, %v2861_v21  ;;  %v1396_v38 = vadd.f32 %v2129_v31, %v1299_v5 }
 0x15e   :  { %v2069_v27 = vpop.f32.mrb[52].mxu0  ;;  %v2901_v39 = vadd.f32 %v2132_v36, %v1302_v7 }
 0x15f   :  { %v2070_v40 = vpop.f32.mrb[53].mxu0  ;;  %v2133_v42 = vpop.f32.mrb[52].mxu1 }
 0x160   :  { %v2071_v29 = vadd.f32 %v2070_v40, %v2069_v27  ;;  %v2072_v45 = vpop.f32.mrb[54].mxu0  ;;  %v2134_v47 = vpop.f32.mrb[53].mxu1 }
 0x161   :  { %v2073_v48 = vpop.f32.mrb[55].mxu0  ;;  %v2135_v49 = vadd.f32 %v2134_v47, %v2133_v42  ;;  %v2136_v50 = vpop.f32.mrb[54].mxu1 }
 0x162   :  { %v1307_v52 = vadd.f32 %v2071_v29, %v2863_v35  ;;  %v2074_v19 = vadd.f32 %v2073_v48, %v2072_v45  ;;  %v2137_v54 = vpop.f32.mrb[55].mxu1 }
 0x163   :  { %v2138_v56 = vadd.f32 %v2137_v54, %v2136_v50 }
 0x164   :  { %v1310_v58 = vadd.f32 %v2074_v19, %v2865_v37  ;;  %v1404_v21 = vadd.f32 %v2135_v49, %v1307_v52 }
 0x166   :  { %v2075_v41 = vpop.f32.mrb[56].mxu0  ;;  %v1407_v59 = vadd.f32 %v2138_v56, %v1310_v58 }
 0x167   :  { %v2076_v60 = vpop.f32.mrb[57].mxu0  ;;  %v2139_v61 = vpop.f32.mrb[56].mxu1 }
 0x168   :  { %v2077_v43 = vadd.f32 %v2076_v60, %v2075_v41  ;;  %v2078_v63 = vpop.f32.mrb[58].mxu0  ;;  %v2140_v1 = vpop.f32.mrb[57].mxu1 }
 0x169   :  { %v2079_v2 = vpop.f32.mrb[59].mxu0  ;;  %v2141_v4 = vadd.f32 %v2140_v1, %v2139_v61  ;;  %v2142_v8 = vpop.f32.mrb[58].mxu1 }
 0x16a   :  { %v1315_v9 = vadd.f32 %v2077_v43, %v2867_v51  ;;  %v2080_v10 = vadd.f32 %v2079_v2, %v2078_v63  ;;  %v2143_v35 = vpop.f32.mrb[59].mxu1 }
 0x16b   :  { %v2144_v11 = vadd.f32 %v2143_v35, %v2142_v8 }
 0x16c   :  { %v1318_v12 = vadd.f32 %v2080_v10, %v2869_v53  ;;  %v1412_v55 = vadd.f32 %v2141_v4, %v1315_v9 }
 0x16e   :  { %v2081_v37 = vpop.f32.mrb[60].mxu0  ;;  %v2907_v13 = vadd.f32 %v2144_v11, %v1318_v12 }
 0x16f   :  { %v2082_v14 = vpop.f32.mrb[61].mxu0  ;;  %v2145_v15 = vpop.f32.mrb[60].mxu1 }
 0x170   :  { %v2083_v57 = vadd.f32 %v2082_v14, %v2081_v37  ;;  %v2084_v17 = vpop.f32.mrb[62].mxu0  ;;  %v2146_v20 = vpop.f32.mrb[61].mxu1 }
 0x171   :  { %v2085_v22 = vpop.f32.mrb[63].mxu0  ;;  %v2147_v23 = vadd.f32 %v2146_v20, %v2145_v15  ;;  %v2148_v25 = vpop.f32.mrb[62].mxu1 }
 0x172   :  { %v1323_v28 = vadd.f32 %v2083_v57, %v2871_v3  ;;  %v2086_v51 = vadd.f32 %v2085_v22, %v2084_v17  ;;  %v2149_v30 = vpop.f32.mrb[63].mxu1 }
 0x173   :  { %v2150_v31 = vadd.f32 %v2149_v30, %v2148_v25 }
 0x174   :  { %v1326_v32 = vadd.f32 %v2086_v51, %v2873_v6  ;;  %v1420_v53 = vadd.f32 %v2147_v23, %v1323_v28 }
 0x176   :  { %v2185_v5 = vpop.f32.mrb[64].mxu0  ;;  %v1423_v33 = vadd.f32 %v2150_v31, %v1326_v32 }
 0x177   :  { %v1469_v34 = vadd.f32 %v2185_v5, %v2883_v44  ;;  %v2193_v36 = vpop.f32.mrb[64].mxu1  ;;  %v1460_v7 = vpop.f32.mrb[65].mxu0 }
 0x178   :  { %v2912_v27 = vadd.f32 %v2193_v36, %v1404_v21  ;;  %v1461_v40 = vadd.f32 %v1460_v7, %v2877_v24  ;;  %v1492_v42 = vpop.f32.mrb[65].mxu1  ;;  %v2186_v29 = vpop.f32.mrb[66].mxu0 }
 0x179   :  { %v2915_v45 = vadd.f32 %v1492_v42, %v1396_v38  ;;  %v1472_v3 = vadd.f32 %v2186_v29, %v2885_v46  ;;  %v2194_v47 = vpop.f32.mrb[66].mxu1  ;;  %v1463_v48 = vpop.f32.mrb[67].mxu0  ;;  %v1626_v58 = vmul.f32 %v1469_v34, %v1469_v34 }
 0x17a   :  { %v2918_v6 = vadd.f32 %v2194_v47, %v1407_v59  ;;  %v1464_v49 = vadd.f32 %v1463_v48, %v2879_v26  ;;  %v1495_v50 = vpop.f32.mrb[67].mxu1  ;;  %v1624_v56 = vmul.f32 %v1461_v40, %v1461_v40  ;;  %v1634_v7 = vmul.f32 %v2912_v27, %v2912_v27 }
 0x17b   :  { %v1856_v44 = vpack.c.bf16 %v1472_v3, %v1469_v34  ;;  %v1496_v52 = vadd.f32 %v1495_v50, %v2901_v39  ;;  %v1627_v4 = vmul.f32 %v1472_v3, %v1472_v3  ;;  %v1632_v32 = vmul.f32 %v2915_v45, %v2915_v45 }
 0x17c   :  { %v1876_v19 = vpack.c.bf16 %v2918_v6, %v2912_v27  ;;  %v1851_v24 = vpack.c.bf16 %v1464_v49, %v1461_v40  ;;  %v1603_v54 = vadd.f32 %v1464_v49, %v1461_v40  ;;  %v1625_v46 = vmul.f32 %v1464_v49, %v1464_v49 }
 0x17d   :  { %1888 = vst [vmem:[%s2968_s2 + $0x8] sm:$0xff] %v1856_v44   ;;  %v1871_v38 = vpack.c.bf16 %v1496_v52, %v2915_v45  ;;  %v1635_v29 = vmul.f32 %v2918_v6, %v2918_v6 }
 0x17e   :  { %1892 = vst [vmem:[%s2968_s2 + $0x28] sm:$0xff] %v1876_v19   ;;  %1852 = vst [vmem:[%s2968_s2] sm:$0xff] %v1851_v24   ;;  %v1604_v26 = vadd.f32 %v1603_v54, %v1469_v34  ;;  %v2189_v39 = vpop.f32.mrb[68].mxu0  ;;  %v1640_v21 = vadd.f32 %v1625_v46, %v1624_v56 }
 0x17f   :  { %1891 = vst [vmem:[%s2968_s2 + $0x20] sm:$0xff] %v1871_v38   ;;  %v1485_v41 = vadd.f32 %v2189_v39, %v2895_v16  ;;  %v2197_v59 = vpop.f32.mrb[68].mxu1  ;;  %v1476_v60 = vpop.f32.mrb[69].mxu0 }
 0x180   :  { %v1517_v61 = vadd.f32 %v2197_v59, %v1420_v53  ;;  %v1477_v43 = vadd.f32 %v1476_v60, %v2889_v62  ;;  %v1605_v63 = vadd.f32 %v1604_v26, %v1472_v3  ;;  %v1508_v1 = vpop.f32.mrb[69].mxu1  ;;  %v2190_v2 = vpop.f32.mrb[70].mxu0  ;;  %v1641_v8 = vadd.f32 %v1640_v21, %v1626_v58 }
 0x181   :  { %v1509_v9 = vadd.f32 %v1508_v1, %v1412_v55  ;;  %v1488_v10 = vadd.f32 %v2190_v2, %v2897_v18  ;;  %v2198_v35 = vpop.f32.mrb[70].mxu1  ;;  %v1479_v11 = vpop.f32.mrb[71].mxu0  ;;  %v1630_v28 = vmul.f32 %v1485_v41, %v1485_v41 }
 0x182   :  { %v1606_v12 = vadd.f32 %v1605_v63, %v1477_v43  ;;  %v1628_v37 = vmul.f32 %v1477_v43, %v1477_v43  ;;  %v1520_v14 = vadd.f32 %v2198_v35, %v1423_v33  ;;  %v1511_v15 = vpop.f32.mrb[71].mxu1  ;;  %v1642_v16 = vadd.f32 %v1641_v8, %v1627_v4 }
 0x183   :  { %v1866_v57 = vpack.c.bf16 %v1488_v10, %v1485_v41  ;;  %v1480_v20 = vadd.f32 %v1479_v11, %v2891_v0  ;;  %v1512_v62 = vadd.f32 %v1511_v15, %v2907_v13  ;;  %v1631_v51 = vmul.f32 %v1488_v10, %v1488_v10 }
 0x184   :  { %v1886_v17 = vpack.c.bf16 %v1520_v14, %v1517_v61  ;;  %v1643_v22 = vadd.f32 %v1642_v16, %v1628_v37  ;;  %v1633_v33 = vmul.f32 %v1496_v52, %v1496_v52  ;;  %v1636_v48 = vmul.f32 %v1509_v9, %v1509_v9 }
 0x185   :  { %1890 = vst [vmem:[%s2968_s2 + $0x18] sm:$0xff] %v1866_v57   ;;  %v1861_v18 = vpack.c.bf16 %v1480_v20, %v1477_v43  ;;  %v1607_v55 = vadd.f32 %v1606_v12, %v1480_v20  ;;  %v1629_v23 = vmul.f32 %v1480_v20, %v1480_v20  ;;  %v1881_v25 = vpack.c.bf16 %v1512_v62, %v1509_v9 }
 0x186   :  { %1894 = vst [vmem:[%s2968_s2 + $0x38] sm:$0xff] %v1886_v17   ;;  %v1637_v44 = vmul.f32 %v1512_v62, %v1512_v62  ;;  %v1638_v24 = vmul.f32 %v1517_v61, %v1517_v61  ;;  %v1639_v56 = vmul.f32 %v1520_v14, %v1520_v14 }
 0x187   :  { %1889 = vst [vmem:[%s2968_s2 + $0x10] sm:$0xff] %v1861_v18   ;;  %v1608_v0 = vadd.f32 %v1607_v55, %v1485_v41  ;;  %v1644_v13 = vadd.f32 %v1643_v22, %v1629_v23  ;;  %1893 = vst [vmem:[%s2968_s2 + $0x30] sm:$0xff] %v1881_v25  }
 0x189   :  { %v1609_v30 = vadd.f32 %v1608_v0, %v1488_v10  ;;  %v1645_v31 = vadd.f32 %v1644_v13, %v1630_v28 }
 0x18b   :  { %v1610_v53 = vadd.f32 %v1609_v30, %v2915_v45  ;;  %v1646_v5 = vadd.f32 %v1645_v31, %v1631_v51 }
 0x18d   :  { %v1647_v34 = vadd.f32 %v1646_v5, %v1632_v32  ;;  %v1611_v36 = vadd.f32 %v1610_v53, %v1496_v52 }
 0x18f   :  { %v1612_v40 = vadd.f32 %v1611_v36, %v2912_v27  ;;  %v1648_v42 = vadd.f32 %v1647_v34, %v1633_v33 }
 0x191   :  { %v1613_v3 = vadd.f32 %v1612_v40, %v2918_v6  ;;  %v1649_v47 = vadd.f32 %v1648_v42, %v1634_v7 }
 0x193   :  { %v1614_v49 = vadd.f32 %v1613_v3, %v1509_v9  ;;  %v1650_v50 = vadd.f32 %v1649_v47, %v1635_v29 }
 0x195   :  { %v1615_v45 = vadd.f32 %v1614_v49, %v1512_v62  ;;  %v1651_v19 = vadd.f32 %v1650_v50, %v1636_v48 }
 0x197   :  { %v1616_v52 = vadd.f32 %v1615_v45, %v1517_v61  ;;  %v1652_v54 = vadd.f32 %v1651_v19, %v1637_v44 }
 0x199   :  { %v1617_v46 = vadd.f32 %v1616_v52, %v1520_v14  ;;  %v1653_v38 = vadd.f32 %v1652_v54, %v1638_v24 }
 0x19b   :  { %v1618_v27 = vrot.slane %v1617_v46, 4  ;;  %v1654_v26 = vadd.f32 %v1653_v38, %v1639_v56 }
 0x19d   :  { %v1619_v39 = vadd.f32 %v1618_v27, %v1617_v46  ;;  %v1655_v58 = vrot.slane %v1654_v26, 4 }
 0x19f   :  { %v1620_v21 = vrot.slane %v1619_v39, 2  ;;  %v1656_v41 = vadd.f32 %v1655_v58, %v1654_v26 }
 0x1a1   :  { %v1621_v6 = vadd.f32 %v1620_v21, %v1619_v39  ;;  %v1657_v59 = vrot.slane %v1656_v41, 2 }
 0x1a3   :  { %v1622_v60 = vrot.slane %v1621_v6, 1  ;;  %v1658_v43 = vadd.f32 %v1657_v59, %v1656_v41 }
 0x1a5   :  { %v1659_v63 = vrot.slane %v1658_v43, 1  ;;  %v1623_v1 = vadd.f32 %v1622_v60, %v1621_v6 }
 0x1a7   :  { %v1660_v2 = vadd.f32 %v1659_v63, %v1658_v43 }
 0x1a9   :  { %v1662_v4 = vsel %vm1661_vm0, %v1623_v1, %v1660_v2 }
 0x1aa   :  { %1663 = vst [vmem:[%s2969_s3] sm:$0x3] %v1662_v4 }

// kernel: extra_res_module_forward.6
= control target key start
LH: loop header
LB: loop body
LE: loop exit
PB: predicated region body
PF: predicated region fallthrough
CT: control target
= control target key end

     0   :  { %vm784_vm0 = vcmask 1040384   ;;  %vm786_vm1 = vcmask 1041408   ;;  %vm788_vm2 = vcmask 1042432   ;;  %s1375_s2 = inlined_call_operand.vmem [shape: bf16[128,128], index: 2, kind: input, shape index: {}]   ;;  %s1376_s3 = inlined_call_operand.vmem [shape: bf16[128,128], index: 3, kind: input, shape index: {}]   ;;  %s1377_s0 = inlined_call_operand.vmem [shape: bf16[128,128], index: 0, kind: input, shape index: {}]   ;;  %s1378_s4 = inlined_call_operand.vmem [shape: f32[2,128], index: 4, kind: input, shape index: {}]   ;;  %s1379_s1 = inlined_call_operand.vmem [shape: bf16[128,128], index: 1, kind: input, shape index: {}]   ;;  %s1380_s5 = inlined_call_operand.vmem [shape: bf16[128,128], index: 5, kind: output, shape index: {0}]   ;;  %s1381_s6 = inlined_call_operand.vmem [shape: bf16[128,128], index: 6, kind: output, shape index: {1}]   ;;  %s1382_s7 = inlined_call_operand.vmem [shape: f32[1,4,128], index: 7, kind: output, shape index: {2}]  }
   0x1   :  { %v1122_v0 = vld [vmem:[%s1375_s2] sm:$0xff]   ;;  %v1124_v2 = vld [vmem:[%s1375_s2 + $0x8] sm:$0xff]   ;;  %v1126_v4 = vld [vmem:[%s1375_s2 + $0x10] sm:$0xff]  }
   0x2   :  { %v1123_v1 = vld [vmem:[%s1376_s3] sm:$0xff]   ;;  %1058 = vmatprep.subr.bf16.mxu0 %v1122_v0  ;;  %v1125_v3 = vld [vmem:[%s1376_s3 + $0x8] sm:$0xff]   ;;  %v1127_v5 = vld [vmem:[%s1376_s3 + $0x10] sm:$0xff]  }
   0x3   :  { %1090 = vmatprep.subr.bf16.mxu1 %v1123_v1  ;;  %1059 = vmatpush3.bf16.msra.mxu0 %v1122_v0  ;;  %v1128_v6 = vld [vmem:[%s1375_s2 + $0x18] sm:$0xff]   ;;  %v1130_v8 = vld [vmem:[%s1375_s2 + $0x20] sm:$0xff]   ;;  %v1132_v10 = vld [vmem:[%s1375_s2 + $0x28] sm:$0xff]  }
   0x4   :  { %1091 = vmatpush3.bf16.msra.mxu1 %v1123_v1  ;;  %1060 = vmatprep.subr.bf16.mxu0 %v1124_v2  ;;  %v1129_v7 = vld [vmem:[%s1376_s3 + $0x18] sm:$0xff]   ;;  %v1131_v9 = vld [vmem:[%s1376_s3 + $0x20] sm:$0xff]   ;;  %v1133_v11 = vld [vmem:[%s1376_s3 + $0x28] sm:$0xff]  }
   0x5   :  { %1092 = vmatprep.subr.bf16.mxu1 %v1125_v3  ;;  %v894_v12 = vld [vmem:[%s1377_s0] sm:$0xff]   ;;  %v1005_v18 = vld [vmem:[%s1377_s0 + $0x8] sm:$0xff]   ;;  %v1006_v23 = vld [vmem:[%s1377_s0 + $0x10] sm:$0xff]  }
   0x6   :  { %v1228_v13 = vld [vmem:[%s1378_s4] ss:$0 sm:$0xff]  ;;  %v1233_v14 = vld [vmem:[%s1378_s4 + $0x1] ss:$0 sm:$0xff]  ;;  %v895_v15 = vunpack.c.l.bf16 %v894_v12  ;;  %v896_v16 = vunpack.c.h.bf16 %v894_v12  ;;  %v899_v21 = vunpack.c.l.bf16 %v1005_v18  ;;  %v900_v22 = vunpack.c.h.bf16 %v1005_v18  ;;  %v1134_v24 = vld [vmem:[%s1375_s2 + $0x30] sm:$0xff]  }
   0x7   :  { %1061 = vmatpush3.bf16.msra.mxu0 %v1124_v2  ;;  %v1138_v17 = vld [vmem:[%s1379_s1] sm:$0xff]   ;;  %v903_v25 = vunpack.c.l.bf16 %v1006_v23  ;;  %v904_v26 = vunpack.c.h.bf16 %v1006_v23  ;;  %v1007_v27 = vld [vmem:[%s1377_s0 + $0x18] sm:$0xff]   ;;  %v1135_v28 = vld [vmem:[%s1376_s3 + $0x30] sm:$0xff]  }
   0x8   :  { %1093 = vmatpush3.bf16.msra.mxu1 %v1125_v3  ;;  %1062 = vmatprep.subr.bf16.mxu0 %v1126_v4  ;;  %v61_v19 = vmul.f32 %v895_v15, %v1228_v13  ;;  %v62_v20 = vmul.f32 %v896_v16, %v1228_v13  ;;  %v63_v31 = vmul.f32 %v899_v21, %v1228_v13  ;;  %v907_v35 = vunpack.c.l.bf16 %v1007_v27  ;;  %v1008_v37 = vld [vmem:[%s1377_s0 + $0x20] sm:$0xff]   ;;  %v1136_v42 = vld [vmem:[%s1375_s2 + $0x38] sm:$0xff]   ;;  %v1009_v56 = vld [vmem:[%s1377_s0 + $0x28] sm:$0xff]  }
   0x9   :  { %1094 = vmatprep.subr.bf16.mxu1 %v1127_v5  ;;  %1106 = vmatprep.mubr.bf16.mxu1 %v1138_v17  ;;  %v64_v32 = vmul.f32 %v900_v22, %v1228_v13  ;;  %v65_v33 = vmul.f32 %v903_v25, %v1228_v13  ;;  %v66_v34 = vmul.f32 %v904_v26, %v1228_v13  ;;  %v908_v36 = vunpack.c.h.bf16 %v1007_v27  ;;  %v1137_v43 = vld [vmem:[%s1376_s3 + $0x38] sm:$0xff]   ;;  %v1010_v58 = vld [vmem:[%s1377_s0 + $0x30] sm:$0xff]   ;;  %v1139_v1 = vld [vmem:[%s1379_s1 + $0x8] sm:$0xff]  }
   0xa   :  { %v82_v29 = vadd.f32 %v1233_v14, %v61_v19  ;;  %v83_v30 = vadd.f32 %v1233_v14, %v62_v20  ;;  %v84_v40 = vadd.f32 %v1233_v14, %v63_v31  ;;  %v911_v46 = vunpack.c.l.bf16 %v1008_v37  ;;  %v1141_v23 = vld [vmem:[%s1379_s1 + $0x18] sm:$0xff]   ;;  %v1142_v27 = vld [vmem:[%s1379_s1 + $0x20] sm:$0xff]  }
   0xb   :  { %1063 = vmatpush3.bf16.msra.mxu0 %v1126_v4  ;;  %v85_v41 = vadd.f32 %v1233_v14, %v64_v32  ;;  %v86_v44 = vadd.f32 %v1233_v14, %v65_v33  ;;  %v87_v45 = vadd.f32 %v1233_v14, %v66_v34  ;;  %v67_v50 = vmul.f32 %v907_v35, %v1228_v13 }
   0xc   :  { %1095 = vmatpush3.bf16.msra.mxu1 %v1127_v5  ;;  %1064 = vmatprep.subr.bf16.mxu0 %v1128_v6  ;;  %v98_v38 = vmax.f32 %v82_v29, 0.0  ;;  %v99_v39 = vmax.f32 %v83_v30, 0.0  ;;  %v100_v48 = vmax.f32 %v84_v40, 0.0  ;;  %v68_v53 = vmul.f32 %v908_v36, %v1228_v13 }
   0xd   :  { %1096 = vmatprep.subr.bf16.mxu1 %v1129_v7  ;;  %v101_v49 = vmax.f32 %v85_v41, 0.0  ;;  %v102_v51 = vmax.f32 %v86_v44, 0.0  ;;  %v103_v52 = vmax.f32 %v87_v45, 0.0  ;;  %v912_v54 = vunpack.c.h.bf16 %v1008_v37  ;;  %v1143_v37 = vld [vmem:[%s1379_s1 + $0x28] sm:$0xff]  }
   0xe   :  { %v114_v47 = vpack.c.bf16 %v99_v39, %v98_v38  ;;  %v69_v55 = vmul.f32 %v911_v46, %v1228_v13  ;;  %v88_v60 = vadd.f32 %v1233_v14, %v67_v50  ;;  %v89_v62 = vadd.f32 %v1233_v14, %v68_v53  ;;  %v1144_v39 = vld [vmem:[%s1379_s1 + $0x30] sm:$0xff]  }
   0xf   :  { %1065 = vmatpush3.bf16.msra.mxu0 %v1128_v6  ;;  %v70_v57 = vmul.f32 %v912_v54, %v1228_v13  ;;  %v115_v59 = vpack.c.bf16 %v101_v49, %v100_v48  ;;  %v116_v61 = vpack.c.bf16 %v103_v52, %v102_v51  ;;  %v915_v63 = vunpack.c.l.bf16 %v1009_v56  ;;  %v1140_v6 = vld [vmem:[%s1379_s1 + $0x10] sm:$0xff]  }
  0x10   :  { %1097 = vmatpush3.bf16.msra.mxu1 %v1129_v7  ;;  %1066 = vmatprep.subr.bf16.mxu0 %v1130_v8  ;;  %v916_v0 = vunpack.c.h.bf16 %v1009_v56  ;;  %v90_v2 = vadd.f32 %v1233_v14, %v69_v55  ;;  %v919_v4 = vunpack.c.l.bf16 %v1010_v58  ;;  %v920_v5 = vunpack.c.h.bf16 %v1010_v58 }
  0x11   :  { %1098 = vmatprep.subr.bf16.mxu1 %v1131_v9  ;;  %1074 = vmatprep.mubr.bf16.mxu0 %v114_v47  ;;  %v91_v3 = vadd.f32 %v1233_v14, %v70_v57  ;;  %v104_v7 = vmax.f32 %v88_v60, 0.0 }
  0x12   :  { %v106_v12 = vmax.f32 %v90_v2, 0.0  ;;  %v73_v16 = vmul.f32 %v919_v4, %v1228_v13  ;;  %v74_v17 = vmul.f32 %v920_v5, %v1228_v13 }
  0x13   :  { %1067 = vmatpush3.bf16.msra.mxu0 %v1130_v8  ;;  %v105_v8 = vmax.f32 %v89_v62, 0.0  ;;  %v107_v15 = vmax.f32 %v91_v3, 0.0 }
  0x14   :  { %1099 = vmatpush3.bf16.msra.mxu1 %v1131_v9  ;;  %1068 = vmatprep.subr.bf16.mxu0 %v1132_v10  ;;  %v71_v9 = vmul.f32 %v915_v63, %v1228_v13  ;;  %v94_v25 = vadd.f32 %v1233_v14, %v73_v16  ;;  %v95_v26 = vadd.f32 %v1233_v14, %v74_v17 }
  0x15   :  { %1100 = vmatprep.subr.bf16.mxu1 %v1133_v11  ;;  %v117_v19 = vpack.c.bf16 %v105_v8, %v104_v7 }
  0x16   :  { %v92_v20 = vadd.f32 %v1233_v14, %v71_v9  ;;  %v110_v32 = vmax.f32 %v94_v25, 0.0  ;;  %v111_v33 = vmax.f32 %v95_v26, 0.0 }
  0x17   :  { %1069 = vmatpush3.bf16.msra.mxu0 %v1132_v10  ;;  %v72_v10 = vmul.f32 %v916_v0, %v1228_v13 }
  0x18   :  { %1101 = vmatpush3.bf16.msra.mxu1 %v1133_v11  ;;  %1070 = vmatprep.subr.bf16.mxu0 %v1134_v24  ;;  %v1011_v11 = vld [vmem:[%s1377_s0 + $0x38] sm:$0xff]   ;;  %v120_v38 = vpack.c.bf16 %v111_v33, %v110_v32 }
  0x19   :  { %1102 = vmatprep.subr.bf16.mxu1 %v1135_v28  ;;  %v923_v18 = vunpack.c.l.bf16 %v1011_v11  ;;  %v93_v21 = vadd.f32 %v1233_v14, %v72_v10  ;;  %v924_v22 = vunpack.c.h.bf16 %v1011_v11 }
  0x1b   :  { %1071 = vmatpush3.bf16.msra.mxu0 %v1134_v24  ;;  %v118_v24 = vpack.c.bf16 %v107_v15, %v106_v12  ;;  %v109_v29 = vmax.f32 %v93_v21, 0.0  ;;  %v75_v30 = vmul.f32 %v923_v18, %v1228_v13  ;;  %v76_v31 = vmul.f32 %v924_v22, %v1228_v13 }
  0x1c   :  { %1103 = vmatpush3.bf16.msra.mxu1 %v1135_v28  ;;  %1072 = vmatprep.subr.bf16.mxu0 %v1136_v42  ;;  %v108_v28 = vmax.f32 %v92_v20, 0.0 }
  0x1d   :  { %1104 = vmatprep.subr.bf16.mxu1 %v1137_v43  ;;  %v96_v35 = vadd.f32 %v1233_v14, %v75_v30  ;;  %v97_v36 = vadd.f32 %v1233_v14, %v76_v31  ;;  %v1145_v14 = vld [vmem:[%s1379_s1 + $0x38] sm:$0xff]  }
  0x1e   :  { %v119_v34 = vpack.c.bf16 %v109_v29, %v108_v28 }
  0x1f   :  { %1073 = vmatpush3.bf16.msra.mxu0 %v1136_v42  ;;  %v112_v13 = vmax.f32 %v96_v35, 0.0  ;;  %v113_v40 = vmax.f32 %v97_v36, 0.0 }
  0x20   :  { %1105 = vmatpush3.bf16.msra.mxu1 %v1137_v43 }
  0x21   :  { %v121_v41 = vpack.c.bf16 %v113_v40, %v112_v13 }
  0x22   :  { %1075 = vmatmul.mubr.bf16.vlgmr.msra.gmra.mrb[0].mxu0 %v115_v59 }
  0x23   :  { %1107 = vmatmul.mubr.bf16.vlgmr.msra.gmra.mrb[0].mxu1 %v1139_v1  ;;  %1078 = vmatprep.mubr.bf16.mxu0 %v116_v61 }
  0x24   :  { %1110 = vmatprep.mubr.bf16.mxu1 %v1140_v6 }
  0x2a   :  { %1079 = vmatmul.mubr.bf16.gmra.mrb[4].mxu0 %v117_v19 }
  0x2b   :  { %1111 = vmatmul.mubr.bf16.gmra.mrb[4].mxu1 %v1141_v23  ;;  %1082 = vmatprep.mubr.bf16.mxu0 %v118_v24 }
  0x2c   :  { %1114 = vmatprep.mubr.bf16.mxu1 %v1142_v27 }
  0x32   :  { %1083 = vmatmul.mubr.bf16.gmra.mrb[8].mxu0 %v119_v34 }
  0x33   :  { %1115 = vmatmul.mubr.bf16.gmra.mrb[8].mxu1 %v1143_v37  ;;  %1086 = vmatprep.mubr.bf16.mxu0 %v120_v38 }
  0x34   :  { %1118 = vmatprep.mubr.bf16.mxu1 %v1144_v39 }
  0x3a   :  { %1087 = vmatmul.mubr.bf16.gmra.mrb[12].mxu0 %v121_v41 }
  0x3b   :  { %1119 = vmatmul.mubr.bf16.gmra.mrb[12].mxu1 %v1145_v14 }
  0xf5   :  { %v1076_v42 = vpop.f32.mrb[0].mxu0 }
  0xf6   :  { %v1108_v43 = vpop.f32.mrb[0].mxu1  ;;  %v220_v44 = vpop.f32.mrb[1].mxu0  ;;  %v691_v60 = vmul.f32 %v1076_v42, %v1076_v42 }
  0xf7   :  { %v445_v45 = vpop.f32.mrb[1].mxu1  ;;  %v1077_v46 = vpop.f32.mrb[2].mxu0  ;;  %v689_v51 = vmul.f32 %v220_v44, %v220_v44  ;;  %v749_v62 = vmul.f32 %v1108_v43, %v1108_v43 }
  0xf8   :  { %v747_v47 = vmul.f32 %v445_v45, %v445_v45  ;;  %v933_v48 = vpack.c.bf16 %v1077_v46, %v1076_v42  ;;  %v1109_v49 = vpop.f32.mrb[2].mxu1  ;;  %v223_v50 = vpop.f32.mrb[3].mxu0  ;;  %v692_v2 = vmul.f32 %v1077_v46, %v1077_v46 }
  0xf9   :  { %v973_v52 = vpack.c.bf16 %v1109_v49, %v1108_v43  ;;  %v928_v53 = vpack.c.bf16 %v223_v50, %v220_v44  ;;  %v668_v54 = vadd.f32 %v223_v50, %v220_v44  ;;  %v448_v55 = vpop.f32.mrb[3].mxu1  ;;  %v690_v56 = vmul.f32 %v223_v50, %v223_v50 }
  0xfa   :  { %1012 = vst [vmem:[%s1380_s5 + $0x8] sm:$0xff] %v933_v48   ;;  %v968_v57 = vpack.c.bf16 %v448_v55, %v445_v45  ;;  %v726_v58 = vadd.f32 %v448_v55, %v445_v45  ;;  %v748_v59 = vmul.f32 %v448_v55, %v448_v55  ;;  %v750_v5 = vmul.f32 %v1109_v49, %v1109_v49 }
  0xfb   :  { %1019 = vst [vmem:[%s1381_s6 + $0x8] sm:$0xff] %v973_v52   ;;  %929 = vst [vmem:[%s1380_s5] sm:$0xff] %v928_v53   ;;  %v669_v61 = vadd.f32 %v1076_v42, %v668_v54  ;;  %v705_v63 = vadd.f32 %v690_v56, %v689_v51 }
  0xfc   :  { %969 = vst [vmem:[%s1381_s6] sm:$0xff] %v968_v57   ;;  %v727_v0 = vadd.f32 %v1108_v43, %v726_v58  ;;  %v763_v1 = vadd.f32 %v748_v59, %v747_v47 }
  0xfd   :  { %v1080_v3 = vpop.f32.mrb[4].mxu0  ;;  %v670_v4 = vadd.f32 %v1077_v46, %v669_v61  ;;  %v706_v6 = vadd.f32 %v705_v63, %v691_v60 }
  0xfe   :  { %v764_v7 = vadd.f32 %v763_v1, %v749_v62  ;;  %v1112_v8 = vpop.f32.mrb[4].mxu1  ;;  %v236_v9 = vpop.f32.mrb[5].mxu0  ;;  %v728_v10 = vadd.f32 %v1109_v49, %v727_v0  ;;  %v695_v34 = vmul.f32 %v1080_v3, %v1080_v3 }
  0xff   :  { %v671_v11 = vadd.f32 %v670_v4, %v236_v9  ;;  %v693_v12 = vmul.f32 %v236_v9, %v236_v9  ;;  %v461_v15 = vpop.f32.mrb[5].mxu1  ;;  %v1081_v16 = vpop.f32.mrb[6].mxu0  ;;  %v707_v17 = vadd.f32 %v706_v6, %v692_v2  ;;  %v753_v36 = vmul.f32 %v1112_v8, %v1112_v8 }
 0x100   :  { %v729_v18 = vadd.f32 %v728_v10, %v461_v15  ;;  %v751_v19 = vmul.f32 %v461_v15, %v461_v15  ;;  %v765_v20 = vadd.f32 %v764_v7, %v750_v5  ;;  %v1113_v21 = vpop.f32.mrb[6].mxu1  ;;  %v239_v22 = vpop.f32.mrb[7].mxu0  ;;  %v943_v23 = vpack.c.bf16 %v1081_v16, %v1080_v3 }
 0x101   :  { %v983_v24 = vpack.c.bf16 %v1113_v21, %v1112_v8  ;;  %v464_v25 = vpop.f32.mrb[7].mxu1  ;;  %v708_v26 = vadd.f32 %v707_v17, %v693_v12  ;;  %v938_v28 = vpack.c.bf16 %v239_v22, %v236_v9  ;;  %v672_v29 = vadd.f32 %v671_v11, %v239_v22 }
 0x102   :  { %v766_v27 = vadd.f32 %v765_v20, %v751_v19  ;;  %1014 = vst [vmem:[%s1380_s5 + $0x18] sm:$0xff] %v943_v23   ;;  %v694_v30 = vmul.f32 %v239_v22, %v239_v22  ;;  %v978_v31 = vpack.c.bf16 %v464_v25, %v461_v15  ;;  %v730_v32 = vadd.f32 %v729_v18, %v464_v25 }
 0x103   :  { %1021 = vst [vmem:[%s1381_s6 + $0x18] sm:$0xff] %v983_v24   ;;  %v752_v33 = vmul.f32 %v464_v25, %v464_v25  ;;  %1013 = vst [vmem:[%s1380_s5 + $0x10] sm:$0xff] %v938_v28   ;;  %v673_v35 = vadd.f32 %v1080_v3, %v672_v29  ;;  %v696_v40 = vmul.f32 %v1081_v16, %v1081_v16 }
 0x104   :  { %v709_v37 = vadd.f32 %v708_v26, %v694_v30  ;;  %1020 = vst [vmem:[%s1381_s6 + $0x10] sm:$0xff] %v978_v31   ;;  %v731_v38 = vadd.f32 %v1112_v8, %v730_v32  ;;  %v754_v43 = vmul.f32 %v1113_v21, %v1113_v21 }
 0x105   :  { %v767_v39 = vadd.f32 %v766_v27, %v752_v33  ;;  %v1084_v13 = vpop.f32.mrb[8].mxu0  ;;  %v674_v42 = vadd.f32 %v1081_v16, %v673_v35 }
 0x106   :  { %v1116_v41 = vpop.f32.mrb[8].mxu1  ;;  %v252_v14 = vpop.f32.mrb[9].mxu0  ;;  %v710_v44 = vadd.f32 %v709_v37, %v695_v34  ;;  %v732_v50 = vadd.f32 %v1113_v21, %v731_v38  ;;  %v699_v5 = vmul.f32 %v1084_v13, %v1084_v13 }
 0x107   :  { %v768_v45 = vadd.f32 %v767_v39, %v753_v36  ;;  %v697_v46 = vmul.f32 %v252_v14, %v252_v14  ;;  %v477_v47 = vpop.f32.mrb[9].mxu1  ;;  %v1085_v48 = vpop.f32.mrb[10].mxu0  ;;  %v675_v49 = vadd.f32 %v674_v42, %v252_v14  ;;  %v757_v8 = vmul.f32 %v1116_v41, %v1116_v41 }
 0x108   :  { %v755_v51 = vmul.f32 %v477_v47, %v477_v47  ;;  %v953_v52 = vpack.c.bf16 %v1085_v48, %v1084_v13  ;;  %v1117_v53 = vpop.f32.mrb[10].mxu1  ;;  %v255_v54 = vpop.f32.mrb[11].mxu0  ;;  %v711_v55 = vadd.f32 %v710_v44, %v696_v40  ;;  %v733_v59 = vadd.f32 %v732_v50, %v477_v47 }
 0x109   :  { %v769_v56 = vadd.f32 %v768_v45, %v754_v43  ;;  %v993_v57 = vpack.c.bf16 %v1117_v53, %v1116_v41  ;;  %v480_v58 = vpop.f32.mrb[11].mxu1  ;;  %v948_v60 = vpack.c.bf16 %v255_v54, %v252_v14  ;;  %v676_v61 = vadd.f32 %v675_v49, %v255_v54 }
 0x10a   :  { %1016 = vst [vmem:[%s1380_s5 + $0x28] sm:$0xff] %v953_v52   ;;  %v712_v62 = vadd.f32 %v711_v55, %v697_v46  ;;  %v698_v0 = vmul.f32 %v255_v54, %v255_v54  ;;  %v988_v1 = vpack.c.bf16 %v480_v58, %v477_v47  ;;  %v734_v3 = vadd.f32 %v733_v59, %v480_v58 }
 0x10b   :  { %v770_v63 = vadd.f32 %v769_v56, %v755_v51  ;;  %1023 = vst [vmem:[%s1381_s6 + $0x28] sm:$0xff] %v993_v57   ;;  %1015 = vst [vmem:[%s1380_s5 + $0x20] sm:$0xff] %v948_v60   ;;  %v677_v2 = vadd.f32 %v1084_v13, %v676_v61  ;;  %v756_v4 = vmul.f32 %v480_v58, %v480_v58 }
 0x10c   :  { %v713_v6 = vadd.f32 %v712_v62, %v698_v0  ;;  %1022 = vst [vmem:[%s1381_s6 + $0x20] sm:$0xff] %v988_v1   ;;  %v735_v9 = vadd.f32 %v1116_v41, %v734_v3  ;;  %v700_v16 = vmul.f32 %v1085_v48, %v1085_v48  ;;  %v758_v17 = vmul.f32 %v1117_v53, %v1117_v53 }
 0x10d   :  { %v1088_v7 = vpop.f32.mrb[12].mxu0  ;;  %v771_v10 = vadd.f32 %v770_v63, %v756_v4  ;;  %v678_v15 = vadd.f32 %v1085_v48, %v677_v2 }
 0x10e   :  { %v1120_v11 = vpop.f32.mrb[12].mxu1  ;;  %v268_v12 = vpop.f32.mrb[13].mxu0  ;;  %v714_v18 = vadd.f32 %v713_v6, %v699_v5  ;;  %v736_v24 = vadd.f32 %v1117_v53, %v735_v9  ;;  %v703_v41 = vmul.f32 %v1088_v7, %v1088_v7 }
 0x10f   :  { %v701_v19 = vmul.f32 %v268_v12, %v268_v12  ;;  %v493_v20 = vpop.f32.mrb[13].mxu1  ;;  %v1089_v21 = vpop.f32.mrb[14].mxu0  ;;  %v772_v22 = vadd.f32 %v771_v10, %v757_v8  ;;  %v679_v23 = vadd.f32 %v678_v15, %v268_v12  ;;  %v761_v43 = vmul.f32 %v1120_v11, %v1120_v11 }
 0x110   :  { %v759_v25 = vmul.f32 %v493_v20, %v493_v20  ;;  %v1121_v26 = vpop.f32.mrb[14].mxu1  ;;  %v271_v27 = vpop.f32.mrb[15].mxu0  ;;  %v715_v28 = vadd.f32 %v714_v18, %v700_v16  ;;  %v963_v29 = vpack.c.bf16 %v1089_v21, %v1088_v7  ;;  %v737_v32 = vadd.f32 %v736_v24, %v493_v20 }
 0x111   :  { %v1003_v30 = vpack.c.bf16 %v1121_v26, %v1120_v11  ;;  %v496_v31 = vpop.f32.mrb[15].mxu1  ;;  %v773_v33 = vadd.f32 %v772_v22, %v758_v17  ;;  %v958_v34 = vpack.c.bf16 %v271_v27, %v268_v12  ;;  %v680_v36 = vadd.f32 %v679_v23, %v271_v27 }
 0x112   :  { %v716_v35 = vadd.f32 %v715_v28, %v701_v19  ;;  %1018 = vst [vmem:[%s1380_s5 + $0x38] sm:$0xff] %v963_v29   ;;  %v702_v37 = vmul.f32 %v271_v27, %v271_v27  ;;  %v998_v38 = vpack.c.bf16 %v496_v31, %v493_v20  ;;  %v738_v13 = vadd.f32 %v737_v32, %v496_v31 }
 0x113   :  { %1025 = vst [vmem:[%s1381_s6 + $0x38] sm:$0xff] %v1003_v30   ;;  %v774_v39 = vadd.f32 %v773_v33, %v759_v25  ;;  %1017 = vst [vmem:[%s1380_s5 + $0x30] sm:$0xff] %v958_v34   ;;  %v760_v40 = vmul.f32 %v496_v31, %v496_v31  ;;  %v681_v14 = vadd.f32 %v1088_v7, %v680_v36 }
 0x114   :  { %v717_v42 = vadd.f32 %v716_v35, %v702_v37  ;;  %1024 = vst [vmem:[%s1381_s6 + $0x30] sm:$0xff] %v998_v38   ;;  %v739_v44 = vadd.f32 %v1120_v11, %v738_v13  ;;  %v704_v46 = vmul.f32 %v1089_v21, %v1089_v21  ;;  %v762_v49 = vmul.f32 %v1121_v26, %v1121_v26 }
 0x115   :  { %v775_v45 = vadd.f32 %v774_v39, %v760_v40  ;;  %v682_v47 = vadd.f32 %v1089_v21, %v681_v14 }
 0x116   :  { %v718_v48 = vadd.f32 %v717_v42, %v703_v41  ;;  %v740_v50 = vadd.f32 %v1121_v26, %v739_v44 }
 0x117   :  { %v776_v51 = vadd.f32 %v775_v45, %v761_v43  ;;  %v683_v52 = vrot.slane %v682_v47, 4 }
 0x118   :  { %v719_v53 = vadd.f32 %v718_v48, %v704_v46  ;;  %v741_v54 = vrot.slane %v740_v50, 4 }
 0x119   :  { %v777_v55 = vadd.f32 %v776_v51, %v762_v49  ;;  %v684_v56 = vadd.f32 %v683_v52, %v682_v47 }
 0x11a   :  { %v720_v57 = vrot.slane %v719_v53, 4  ;;  %v742_v58 = vadd.f32 %v741_v54, %v740_v50 }
 0x11b   :  { %v778_v59 = vrot.slane %v777_v55, 4  ;;  %v685_v60 = vrot.slane %v684_v56, 2 }
 0x11c   :  { %v721_v61 = vadd.f32 %v720_v57, %v719_v53  ;;  %v743_v62 = vrot.slane %v742_v58, 2 }
 0x11d   :  { %v779_v63 = vadd.f32 %v778_v59, %v777_v55  ;;  %v686_v0 = vadd.f32 %v685_v60, %v684_v56 }
 0x11e   :  { %v722_v1 = vrot.slane %v721_v61, 2  ;;  %v744_v2 = vadd.f32 %v743_v62, %v742_v58 }
 0x11f   :  { %v780_v3 = vrot.slane %v779_v63, 2  ;;  %v687_v4 = vrot.slane %v686_v0, 1 }
 0x120   :  { %v723_v5 = vadd.f32 %v722_v1, %v721_v61  ;;  %v745_v6 = vrot.slane %v744_v2, 1 }
 0x121   :  { %v781_v7 = vadd.f32 %v780_v3, %v779_v63  ;;  %v688_v10 = vadd.f32 %v687_v4, %v686_v0 }
 0x122   :  { %v724_v8 = vrot.slane %v723_v5, 1  ;;  %v746_v12 = vadd.f32 %v745_v6, %v744_v2 }
 0x123   :  { %v782_v9 = vrot.slane %v781_v7, 1 }
 0x124   :  { %v725_v11 = vadd.f32 %v724_v8, %v723_v5 }
 0x125   :  { %v783_v16 = vadd.f32 %v782_v9, %v781_v7 }
 0x126   :  { %v785_v15 = vsel %vm784_vm0, %v688_v10, %v725_v11 }
 0x127   :  { %v787_v17 = vsel %vm786_vm1, %v785_v15, %v746_v12 }
 0x128   :  { %v789_v18 = vsel %vm788_vm2, %v787_v17, %v783_v16 }
 0x129   :  { %790 = vst [vmem:[%s1382_s7] sm:$0xf] %v789_v18 }

</bundles_post_ra>
